<compile_context>
chip_gen: v7x
topology: tpu7x:2x2x1
jax: 0.10.0
libtpu: 0.0.40
codegen_flags: <defaults>
</compile_context>

<pallas_src>
import jax
import jax.numpy as jnp
from jax.experimental import pallas as pl
from jax.experimental.pallas import tpu as pltpu  # noqa: F401  (TPU backend)


# ----------------------------- Pallas kernels ------------------------------

def _conv_pool_kernel(p_ref, w_ref, b_ref, o_ref):
    """o = relu(max_t(p[t] @ w) + b)  ==  MaxPool2d(2,2)(ReLU(Conv2d(2x2)(x))).

    p_ref: (4, M, K) bf16   (4 pool taps of im2col patches)
    w_ref: (K, Cout) bf16   b_ref: (1, Cout) f32   o_ref: (M, Cout) bf16
    """
    w = w_ref[...]
    acc = jnp.dot(p_ref[0], w, preferred_element_type=jnp.float32)
    for t in range(1, 4):                      # static unroll: 4 MXU calls + VPU max
        acc = jnp.maximum(
            acc, jnp.dot(p_ref[t], w, preferred_element_type=jnp.float32))
    o_ref[...] = jnp.maximum(acc + b_ref[...], 0.0).astype(o_ref.dtype)


def conv_relu_pool(patches, w, b):
    """patches:(4,M,K) bf16, w:(K,C) bf16, b:(1,C) f32 -> (M,C) bf16."""
    _, m, k = patches.shape
    c = w.shape[1]
    return pl.pallas_call(
        _conv_pool_kernel,
        out_shape=jax.ShapeDtypeStruct((m, c), jnp.bfloat16),
        grid=(1,),
        in_specs=[
            pl.BlockSpec((4, m, k), lambda i: (0, 0, 0)),
            pl.BlockSpec((k, c), lambda i: (0, 0)),
            pl.BlockSpec((1, c), lambda i: (0, 0)),
        ],
        out_specs=pl.BlockSpec((m, c), lambda i: (0, 0)),
    )(patches, w, b)


def _head_kernel(x_ref, w3_ref, b3_ref, w4_ref, b4_ref, o_ref):
    """Fused hidden_layer3 + output_layer: (x @ w3 + b3) @ w4 + b4."""
    h = jnp.dot(x_ref[...], w3_ref[...], preferred_element_type=jnp.float32)
    h = h + b3_ref[...]
    o = jnp.dot(h, w4_ref[...], preferred_element_type=jnp.float32) + b4_ref[...]
    o_ref[...] = o.astype(o_ref.dtype)


def fc_head(x, w3, b3, w4, b4):
    n, k3 = x.shape
    h = w3.shape[1]
    c = w4.shape[1]
    return pl.pallas_call(
        _head_kernel,
        out_shape=jax.ShapeDtypeStruct((n, c), jnp.float32),
        grid=(1,),
        in_specs=[
            pl.BlockSpec((n, k3), lambda i: (0, 0)),
            pl.BlockSpec((k3, h), lambda i: (0, 0)),
            pl.BlockSpec((1, h), lambda i: (0, 0)),
            pl.BlockSpec((h, c), lambda i: (0, 0)),
            pl.BlockSpec((1, c), lambda i: (0, 0)),
        ],
        out_specs=pl.BlockSpec((n, c), lambda i: (0, 0)),
    )(x, w3, b3, w4, b4)


# ------------------------------- XLA glue ----------------------------------

def _pool_conv_patches(x_nhwc, ph, pw):
    """Pool-tap-major im2col for Conv2d(2x2, stride=1) followed by MaxPool2d(2,2).

    x_nhwc: (N, H, W, C)  ->  (4, N*ph*pw, C*4)
    patches[t=(py,px), m=(n,i,j), k=(ci,ky,kx)] = x[n, 2i+py+ky, 2j+px+kx, ci]
    K ordering (ci, ky, kx) matches torch_w.reshape(Cout, Cin*4).
    """
    n, _, _, c = x_nhwc.shape
    taps = []
    for py in (0, 1):
        for px in (0, 1):
            sub = []
            for ky in (0, 1):
                for kx in (0, 1):
                    sub.append(x_nhwc[:, py + ky: py + ky + 2 * ph: 2,
                                      px + kx: px + kx + 2 * pw: 2, :])
            p = jnp.stack(sub, axis=-1)                  # (N, ph, pw, C, 4)
            taps.append(p.reshape(n * ph * pw, c * 4))
    return jnp.stack(taps, axis=0)                       # (4, M, C*4)


# ----------------------------- parameters / model ---------------------------

def init_params(key, num_features):
    """PyTorch-default-style uniform(+-1/sqrt(fan_in)) init, stored pre-laid-out:
    conv weights as (Cin*4, Cout) bf16, fc weights transposed, and w3's input
    dim permuted from torch's (c, h, w) flatten order to our (h, w, c) order."""
    ks = jax.random.split(key, 8)

    def u(k, shape, fan_in):
        bound = 1.0 / jnp.sqrt(jnp.float32(fan_in))
        return jax.random.uniform(k, shape, jnp.float32, -bound, bound)

    w1 = u(ks[0], (64, num_features, 2, 2), num_features * 4)
    w2 = u(ks[2], (32, 64, 2, 2), 64 * 4)
    w3 = u(ks[4], (32, 32 * 5 * 5), 32 * 5 * 5)
    w4 = u(ks[6], (10, 32), 32)
    return {
        "w1": w1.reshape(64, num_features * 4).T.astype(jnp.bfloat16),   # (Cin*4, 64)
        "b1": u(ks[1], (1, 64), num_features * 4),
        "w2": w2.reshape(32, 64 * 4).T.astype(jnp.bfloat16),             # (256, 32)
        "b2": u(ks[3], (1, 32), 64 * 4),
        # torch flattens NCHW as (c, h, w); our pooled activation is (h, w, c):
        "w3": w3.reshape(32, 32, 5, 5).transpose(2, 3, 1, 0)
                .reshape(800, 32).astype(jnp.bfloat16),                  # (800, 32)
        "b3": u(ks[5], (1, 32), 32 * 5 * 5),
        "w4": w4.T.astype(jnp.float32),                                  # (32, 10)
        "b4": u(ks[7], (1, 10), 32),
    }


@jax.jit
def cnn_forward(params, x):
    n, _, hh, ww = x.shape
    ph1, pw1 = (hh - 1) // 2, (ww - 1) // 2       # conv(2x2,s1) then floor maxpool(2,2)
    ph2, pw2 = (ph1 - 1) // 2, (pw1 - 1) // 2
    x = jnp.transpose(x, (0, 2, 3, 1)).astype(jnp.bfloat16)         # NCHW -> NHWC bf16

    # hidden_layer1: Conv2d -> ReLU -> MaxPool2d (+ Dropout: identity), one kernel
    p1 = _pool_conv_patches(x, ph1, pw1)                            # (4, N*121, Cin*4)
    a1 = conv_relu_pool(p1, params["w1"], params["b1"])             # (N*121, 64) bf16
    a1 = a1.reshape(n, ph1, pw1, 64)                                # free (row-major)

    # hidden_layer2: Conv2d -> ReLU -> MaxPool2d (+ Dropout: identity), one kernel
    p2 = _pool_conv_patches(a1, ph2, pw2)                           # (4, N*25, 256)
    a2 = conv_relu_pool(p2, params["w2"], params["b2"])             # (N*25, 32) bf16

    # flatten: rows are (n, h, w)-major, channels last -> (N, 800) in (h, w, c)
    # order; w3 columns were permuted at init to match torch's (c, h, w) flatten.
    xf = a2.reshape(n, ph2 * pw2 * 32)
    # TODO(synk): Dropout(0.2) layers are identity in eval/inference mode (no RNG).
    return fc_head(xf, params["w3"], params["b3"], params["w4"], params["b4"])


if __name__ == "__main__":
    key = jax.random.PRNGKey(0)
    kp, kx = jax.random.split(key)
    num_features = 3
    # 24x24 spatial: conv->23, pool->11, conv->10, pool->5  => 32*5*5 = 800 flatten
    x = jax.random.normal(kx, (2, num_features, 24, 24), jnp.float32)
    params = init_params(kp, num_features)
    out = cnn_forward(params, x)
    jax.block_until_ready(out)
    assert out.shape == (2, 10) and out.dtype == jnp.float32
    print("KERNEL_OK")
</pallas_src>

<mosaic_0001>
module attributes {stable_mosaic.version = 11 : i64} {
  func.func @_conv_pool_kernel(%arg0: i32, %arg1: memref<4x242x12xbf16, #tpu.memory_space<vmem>>, %arg2: memref<12x64xbf16, #tpu.memory_space<vmem>>, %arg3: memref<1x64xf32, #tpu.memory_space<vmem>>, %arg4: memref<242x64xbf16, #tpu.memory_space<vmem>>) attributes {dimension_semantics = [#tpu.dimension_semantics<arbitrary>], iteration_bounds = array<i64: 1>, scalar_prefetch = 0 : i64, scratch_operands = 0 : i64, tpu.core_type = #tpu.core_type<tc>, window_params = [{pipeline_mode = #tpu.pipeline_mode<synchronous>, transform_indices = @transform_0, window_bounds = array<i64: 4, 242, 12>}, {pipeline_mode = #tpu.pipeline_mode<synchronous>, transform_indices = @transform_1, window_bounds = array<i64: 12, 64>}, {pipeline_mode = #tpu.pipeline_mode<synchronous>, transform_indices = @transform_2, window_bounds = array<i64: 1, 64>}, {pipeline_mode = #tpu.pipeline_mode<synchronous>, transform_indices = @transform_3, window_bounds = array<i64: 242, 64>}]} {
    %c0 = arith.constant 0 : index
    %c0_0 = arith.constant 0 : index
    %0 = vector.load %arg2[%c0, %c0_0] : memref<12x64xbf16, #tpu.memory_space<vmem>>, vector<12x64xbf16>
    %c0_1 = arith.constant 0 : index
    %c0_2 = arith.constant 0 : index
    %c0_3 = arith.constant 0 : index
    %1 = vector.load %arg1[%c0_1, %c0_2, %c0_3] : memref<4x242x12xbf16, #tpu.memory_space<vmem>>, vector<1x242x12xbf16>
    %2 = vector.shape_cast %1 : vector<1x242x12xbf16> to vector<242x12xbf16>
    %cst = arith.constant dense<0.000000e+00> : vector<242x64xf32>
    %3 = tpu.matmul %2, %0, %cst {dimension_numbers = #tpu.dot_dimension_numbers<[1], [0], [0], [1], [0, 0, 1, 1], [], []>} : vector<242x12xbf16>, vector<12x64xbf16>, vector<242x64xf32> -> vector<242x64xf32>
    %c1 = arith.constant 1 : index
    %c0_4 = arith.constant 0 : index
    %c0_5 = arith.constant 0 : index
    %4 = vector.load %arg1[%c1, %c0_4, %c0_5] : memref<4x242x12xbf16, #tpu.memory_space<vmem>>, vector<1x242x12xbf16>
    %5 = vector.shape_cast %4 : vector<1x242x12xbf16> to vector<242x12xbf16>
    %cst_6 = arith.constant dense<0.000000e+00> : vector<242x64xf32>
    %6 = tpu.matmul %5, %0, %cst_6 {dimension_numbers = #tpu.dot_dimension_numbers<[1], [0], [0], [1], [0, 0, 1, 1], [], []>} : vector<242x12xbf16>, vector<12x64xbf16>, vector<242x64xf32> -> vector<242x64xf32>
    %7 = arith.maximumf %3, %6 : vector<242x64xf32>
    %c2 = arith.constant 2 : index
    %c0_7 = arith.constant 0 : index
    %c0_8 = arith.constant 0 : index
    %8 = vector.load %arg1[%c2, %c0_7, %c0_8] : memref<4x242x12xbf16, #tpu.memory_space<vmem>>, vector<1x242x12xbf16>
    %9 = vector.shape_cast %8 : vector<1x242x12xbf16> to vector<242x12xbf16>
    %cst_9 = arith.constant dense<0.000000e+00> : vector<242x64xf32>
    %10 = tpu.matmul %9, %0, %cst_9 {dimension_numbers = #tpu.dot_dimension_numbers<[1], [0], [0], [1], [0, 0, 1, 1], [], []>} : vector<242x12xbf16>, vector<12x64xbf16>, vector<242x64xf32> -> vector<242x64xf32>
    %11 = arith.maximumf %7, %10 : vector<242x64xf32>
    %c3 = arith.constant 3 : index
    %c0_10 = arith.constant 0 : index
    %c0_11 = arith.constant 0 : index
    %12 = vector.load %arg1[%c3, %c0_10, %c0_11] : memref<4x242x12xbf16, #tpu.memory_space<vmem>>, vector<1x242x12xbf16>
    %13 = vector.shape_cast %12 : vector<1x242x12xbf16> to vector<242x12xbf16>
    %cst_12 = arith.constant dense<0.000000e+00> : vector<242x64xf32>
    %14 = tpu.matmul %13, %0, %cst_12 {dimension_numbers = #tpu.dot_dimension_numbers<[1], [0], [0], [1], [0, 0, 1, 1], [], []>} : vector<242x12xbf16>, vector<12x64xbf16>, vector<242x64xf32> -> vector<242x64xf32>
    %15 = arith.maximumf %11, %14 : vector<242x64xf32>
    %c0_13 = arith.constant 0 : index
    %c0_14 = arith.constant 0 : index
    %16 = vector.load %arg3[%c0_13, %c0_14] : memref<1x64xf32, #tpu.memory_space<vmem>>, vector<1x64xf32>
    %17 = vector.broadcast %16 : vector<1x64xf32> to vector<242x64xf32>
    %18 = arith.addf %15, %17 : vector<242x64xf32>
    %cst_15 = arith.constant 0.000000e+00 : f32
    %19 = vector.broadcast %cst_15 : f32 to vector<242x64xf32>
    %20 = arith.maximumf %18, %19 : vector<242x64xf32>
    %21 = arith.truncf %20 : vector<242x64xf32> to vector<242x64xbf16>
    %c0_16 = arith.constant 0 : index
    %c0_17 = arith.constant 0 : index
    %22 = vector.load %arg4[%c0_16, %c0_17] : memref<242x64xbf16, #tpu.memory_space<vmem>>, vector<242x64xbf16>
    tpu.vector_store %arg4[%c0_16, %c0_17], %21 {strides = array<i32>} : memref<242x64xbf16, #tpu.memory_space<vmem>>, vector<242x64xbf16>,
    return
  }
  func.func @transform_0(%arg0: i32) -> (i32, i32, i32) {
    %c0_i32 = arith.constant 0 : i32
    %c0_i32_0 = arith.constant 0 : i32
    %c0_i32_1 = arith.constant 0 : i32
    %c0_i32_2 = arith.constant 0 : i32
    return %c0_i32, %c0_i32_0, %c0_i32_1 : i32, i32, i32
  }
  func.func @transform_1(%arg0: i32) -> (i32, i32) {
    %c0_i32 = arith.constant 0 : i32
    %c0_i32_0 = arith.constant 0 : i32
    %c0_i32_1 = arith.constant 0 : i32
    return %c0_i32, %c0_i32_0 : i32, i32
  }
  func.func @transform_2(%arg0: i32) -> (i32, i32) {
    %c0_i32 = arith.constant 0 : i32
    %c0_i32_0 = arith.constant 0 : i32
    %c0_i32_1 = arith.constant 0 : i32
    return %c0_i32, %c0_i32_0 : i32, i32
  }
  func.func @transform_3(%arg0: i32) -> (i32, i32) {
    %c0_i32 = arith.constant 0 : i32
    %c0_i32_0 = arith.constant 0 : i32
    %c0_i32_1 = arith.constant 0 : i32
    return %c0_i32, %c0_i32_0 : i32, i32
  }
}

module attributes {stable_mosaic.version = 11 : i64} {
  func.func @_conv_pool_kernel(%arg0: i32, %arg1: memref<4x50x256xbf16, #tpu.memory_space<vmem>>, %arg2: memref<256x32xbf16, #tpu.memory_space<vmem>>, %arg3: memref<1x32xf32, #tpu.memory_space<vmem>>, %arg4: memref<50x32xbf16, #tpu.memory_space<vmem>>) attributes {dimension_semantics = [#tpu.dimension_semantics<arbitrary>], iteration_bounds = array<i64: 1>, scalar_prefetch = 0 : i64, scratch_operands = 0 : i64, tpu.core_type = #tpu.core_type<tc>, window_params = [{pipeline_mode = #tpu.pipeline_mode<synchronous>, transform_indices = @transform_0, window_bounds = array<i64: 4, 50, 256>}, {pipeline_mode = #tpu.pipeline_mode<synchronous>, transform_indices = @transform_1, window_bounds = array<i64: 256, 32>}, {pipeline_mode = #tpu.pipeline_mode<synchronous>, transform_indices = @transform_2, window_bounds = array<i64: 1, 32>}, {pipeline_mode = #tpu.pipeline_mode<synchronous>, transform_indices = @transform_3, window_bounds = array<i64: 50, 32>}]} {
    %c0 = arith.constant 0 : index
    %c0_0 = arith.constant 0 : index
    %0 = vector.load %arg2[%c0, %c0_0] : memref<256x32xbf16, #tpu.memory_space<vmem>>, vector<256x32xbf16>
    %c0_1 = arith.constant 0 : index
    %c0_2 = arith.constant 0 : index
    %c0_3 = arith.constant 0 : index
    %1 = vector.load %arg1[%c0_1, %c0_2, %c0_3] : memref<4x50x256xbf16, #tpu.memory_space<vmem>>, vector<1x50x256xbf16>
    %2 = vector.shape_cast %1 : vector<1x50x256xbf16> to vector<50x256xbf16>
    %cst = arith.constant dense<0.000000e+00> : vector<50x32xf32>
    %3 = tpu.matmul %2, %0, %cst {dimension_numbers = #tpu.dot_dimension_numbers<[1], [0], [0], [1], [0, 0, 1, 1], [], []>} : vector<50x256xbf16>, vector<256x32xbf16>, vector<50x32xf32> -> vector<50x32xf32>
    %c1 = arith.constant 1 : index
    %c0_4 = arith.constant 0 : index
    %c0_5 = arith.constant 0 : index
    %4 = vector.load %arg1[%c1, %c0_4, %c0_5] : memref<4x50x256xbf16, #tpu.memory_space<vmem>>, vector<1x50x256xbf16>
    %5 = vector.shape_cast %4 : vector<1x50x256xbf16> to vector<50x256xbf16>
    %cst_6 = arith.constant dense<0.000000e+00> : vector<50x32xf32>
    %6 = tpu.matmul %5, %0, %cst_6 {dimension_numbers = #tpu.dot_dimension_numbers<[1], [0], [0], [1], [0, 0, 1, 1], [], []>} : vector<50x256xbf16>, vector<256x32xbf16>, vector<50x32xf32> -> vector<50x32xf32>
    %7 = arith.maximumf %3, %6 : vector<50x32xf32>
    %c2 = arith.constant 2 : index
    %c0_7 = arith.constant 0 : index
    %c0_8 = arith.constant 0 : index
    %8 = vector.load %arg1[%c2, %c0_7, %c0_8] : memref<4x50x256xbf16, #tpu.memory_space<vmem>>, vector<1x50x256xbf16>
    %9 = vector.shape_cast %8 : vector<1x50x256xbf16> to vector<50x256xbf16>
    %cst_9 = arith.constant dense<0.000000e+00> : vector<50x32xf32>
    %10 = tpu.matmul %9, %0, %cst_9 {dimension_numbers = #tpu.dot_dimension_numbers<[1], [0], [0], [1], [0, 0, 1, 1], [], []>} : vector<50x256xbf16>, vector<256x32xbf16>, vector<50x32xf32> -> vector<50x32xf32>
    %11 = arith.maximumf %7, %10 : vector<50x32xf32>
    %c3 = arith.constant 3 : index
    %c0_10 = arith.constant 0 : index
    %c0_11 = arith.constant 0 : index
    %12 = vector.load %arg1[%c3, %c0_10, %c0_11] : memref<4x50x256xbf16, #tpu.memory_space<vmem>>, vector<1x50x256xbf16>
    %13 = vector.shape_cast %12 : vector<1x50x256xbf16> to vector<50x256xbf16>
    %cst_12 = arith.constant dense<0.000000e+00> : vector<50x32xf32>
    %14 = tpu.matmul %13, %0, %cst_12 {dimension_numbers = #tpu.dot_dimension_numbers<[1], [0], [0], [1], [0, 0, 1, 1], [], []>} : vector<50x256xbf16>, vector<256x32xbf16>, vector<50x32xf32> -> vector<50x32xf32>
    %15 = arith.maximumf %11, %14 : vector<50x32xf32>
    %c0_13 = arith.constant 0 : index
    %c0_14 = arith.constant 0 : index
    %16 = vector.load %arg3[%c0_13, %c0_14] : memref<1x32xf32, #tpu.memory_space<vmem>>, vector<1x32xf32>
    %17 = vector.broadcast %16 : vector<1x32xf32> to vector<50x32xf32>
    %18 = arith.addf %15, %17 : vector<50x32xf32>
    %cst_15 = arith.constant 0.000000e+00 : f32
    %19 = vector.broadcast %cst_15 : f32 to vector<50x32xf32>
    %20 = arith.maximumf %18, %19 : vector<50x32xf32>
    %21 = arith.truncf %20 : vector<50x32xf32> to vector<50x32xbf16>
    %c0_16 = arith.constant 0 : index
    %c0_17 = arith.constant 0 : index
    %22 = vector.load %arg4[%c0_16, %c0_17] : memref<50x32xbf16, #tpu.memory_space<vmem>>, vector<50x32xbf16>
    tpu.vector_store %arg4[%c0_16, %c0_17], %21 {strides = array<i32>} : memref<50x32xbf16, #tpu.memory_space<vmem>>, vector<50x32xbf16>,
    return
  }
  func.func @transform_0(%arg0: i32) -> (i32, i32, i32) {
    %c0_i32 = arith.constant 0 : i32
    %c0_i32_0 = arith.constant 0 : i32
    %c0_i32_1 = arith.constant 0 : i32
    %c0_i32_2 = arith.constant 0 : i32
    return %c0_i32, %c0_i32_0, %c0_i32_1 : i32, i32, i32
  }
  func.func @transform_1(%arg0: i32) -> (i32, i32) {
    %c0_i32 = arith.constant 0 : i32
    %c0_i32_0 = arith.constant 0 : i32
    %c0_i32_1 = arith.constant 0 : i32
    return %c0_i32, %c0_i32_0 : i32, i32
  }
  func.func @transform_2(%arg0: i32) -> (i32, i32) {
    %c0_i32 = arith.constant 0 : i32
    %c0_i32_0 = arith.constant 0 : i32
    %c0_i32_1 = arith.constant 0 : i32
    return %c0_i32, %c0_i32_0 : i32, i32
  }
  func.func @transform_3(%arg0: i32) -> (i32, i32) {
    %c0_i32 = arith.constant 0 : i32
    %c0_i32_0 = arith.constant 0 : i32
    %c0_i32_1 = arith.constant 0 : i32
    return %c0_i32, %c0_i32_0 : i32, i32
  }
}

module attributes {stable_mosaic.version = 11 : i64} {
  func.func @_head_kernel(%arg0: i32, %arg1: memref<2x800xbf16, #tpu.memory_space<vmem>>, %arg2: memref<800x32xbf16, #tpu.memory_space<vmem>>, %arg3: memref<1x32xf32, #tpu.memory_space<vmem>>, %arg4: memref<32x10xf32, #tpu.memory_space<vmem>>, %arg5: memref<1x10xf32, #tpu.memory_space<vmem>>, %arg6: memref<2x10xf32, #tpu.memory_space<vmem>>) attributes {dimension_semantics = [#tpu.dimension_semantics<arbitrary>], iteration_bounds = array<i64: 1>, scalar_prefetch = 0 : i64, scratch_operands = 0 : i64, tpu.core_type = #tpu.core_type<tc>, window_params = [{pipeline_mode = #tpu.pipeline_mode<synchronous>, transform_indices = @transform_0, window_bounds = array<i64: 2, 800>}, {pipeline_mode = #tpu.pipeline_mode<synchronous>, transform_indices = @transform_1, window_bounds = array<i64: 800, 32>}, {pipeline_mode = #tpu.pipeline_mode<synchronous>, transform_indices = @transform_2, window_bounds = array<i64: 1, 32>}, {pipeline_mode = #tpu.pipeline_mode<synchronous>, transform_indices = @transform_3, window_bounds = array<i64: 32, 10>}, {pipeline_mode = #tpu.pipeline_mode<synchronous>, transform_indices = @transform_4, window_bounds = array<i64: 1, 10>}, {pipeline_mode = #tpu.pipeline_mode<synchronous>, transform_indices = @transform_5, window_bounds = array<i64: 2, 10>}]} {
    %c0 = arith.constant 0 : index
    %c0_0 = arith.constant 0 : index
    %0 = vector.load %arg1[%c0, %c0_0] : memref<2x800xbf16, #tpu.memory_space<vmem>>, vector<2x800xbf16>
    %c0_1 = arith.constant 0 : index
    %c0_2 = arith.constant 0 : index
    %1 = vector.load %arg2[%c0_1, %c0_2] : memref<800x32xbf16, #tpu.memory_space<vmem>>, vector<800x32xbf16>
    %cst = arith.constant dense<0.000000e+00> : vector<2x32xf32>
    %2 = tpu.matmul %0, %1, %cst {dimension_numbers = #tpu.dot_dimension_numbers<[1], [0], [0], [1], [0, 0, 1, 1], [], []>} : vector<2x800xbf16>, vector<800x32xbf16>, vector<2x32xf32> -> vector<2x32xf32>
    %c0_3 = arith.constant 0 : index
    %c0_4 = arith.constant 0 : index
    %3 = vector.load %arg3[%c0_3, %c0_4] : memref<1x32xf32, #tpu.memory_space<vmem>>, vector<1x32xf32>
    %4 = vector.broadcast %3 : vector<1x32xf32> to vector<2x32xf32>
    %5 = arith.addf %2, %4 : vector<2x32xf32>
    %c0_5 = arith.constant 0 : index
    %c0_6 = arith.constant 0 : index
    %6 = vector.load %arg4[%c0_5, %c0_6] : memref<32x10xf32, #tpu.memory_space<vmem>>, vector<32x10xf32>
    %cst_7 = arith.constant dense<0.000000e+00> : vector<2x10xf32>
    %7 = tpu.matmul %5, %6, %cst_7 {dimension_numbers = #tpu.dot_dimension_numbers<[1], [0], [0], [1], [0, 0, 1, 1], [], []>} : vector<2x32xf32>, vector<32x10xf32>, vector<2x10xf32> -> vector<2x10xf32>
    %c0_8 = arith.constant 0 : index
    %c0_9 = arith.constant 0 : index
    %8 = vector.load %arg5[%c0_8, %c0_9] : memref<1x10xf32, #tpu.memory_space<vmem>>, vector<1x10xf32>
    %9 = vector.broadcast %8 : vector<1x10xf32> to vector<2x10xf32>
    %10 = arith.addf %7, %9 : vector<2x10xf32>
    %c0_10 = arith.constant 0 : index
    %c0_11 = arith.constant 0 : index
    %11 = vector.load %arg6[%c0_10, %c0_11] : memref<2x10xf32, #tpu.memory_space<vmem>>, vector<2x10xf32>
    tpu.vector_store %arg6[%c0_10, %c0_11], %10 {strides = array<i32>} : memref<2x10xf32, #tpu.memory_space<vmem>>, vector<2x10xf32>,
    return
  }
  func.func @transform_0(%arg0: i32) -> (i32, i32) {
    %c0_i32 = arith.constant 0 : i32
    %c0_i32_0 = arith.constant 0 : i32
    %c0_i32_1 = arith.constant 0 : i32
    return %c0_i32, %c0_i32_0 : i32, i32
  }
  func.func @transform_1(%arg0: i32) -> (i32, i32) {
    %c0_i32 = arith.constant 0 : i32
    %c0_i32_0 = arith.constant 0 : i32
    %c0_i32_1 = arith.constant 0 : i32
    return %c0_i32, %c0_i32_0 : i32, i32
  }
  func.func @transform_2(%arg0: i32) -> (i32, i32) {
    %c0_i32 = arith.constant 0 : i32
    %c0_i32_0 = arith.constant 0 : i32
    %c0_i32_1 = arith.constant 0 : i32
    return %c0_i32, %c0_i32_0 : i32, i32
  }
  func.func @transform_3(%arg0: i32) -> (i32, i32) {
    %c0_i32 = arith.constant 0 : i32
    %c0_i32_0 = arith.constant 0 : i32
    %c0_i32_1 = arith.constant 0 : i32
    return %c0_i32, %c0_i32_0 : i32, i32
  }
  func.func @transform_4(%arg0: i32) -> (i32, i32) {
    %c0_i32 = arith.constant 0 : i32
    %c0_i32_0 = arith.constant 0 : i32
    %c0_i32_1 = arith.constant 0 : i32
    return %c0_i32, %c0_i32_0 : i32, i32
  }
  func.func @transform_5(%arg0: i32) -> (i32, i32) {
    %c0_i32 = arith.constant 0 : i32
    %c0_i32_0 = arith.constant 0 : i32
    %c0_i32_1 = arith.constant 0 : i32
    return %c0_i32, %c0_i32_0 : i32, i32
  }
}

</mosaic_0001>

<bundles_post_ra>
// kernel: cnn_forward.3
= control target key start
LH: loop header
LB: loop body
LE: loop exit
PB: predicated region body
PF: predicated region fallthrough
CT: control target
= control target key end

     0   :  { %vm180_vm0 = vcmask 1045504   ;;  %vm131_vm1 = vcmask 97280   ;;  %vm1585_vm2 = vcmask 519168   ;;  %vm1616_vm3 = vcmask 516096   ;;  %s2902_s1 = inlined_call_operand.vmem [shape: bf16[12,64], index: 1, kind: input, shape index: {}]   ;;  %s2903_s0 = inlined_call_operand.vmem [shape: bf16[4,242,12], index: 0, kind: input, shape index: {}]   ;;  %s2904_s2 = inlined_call_operand.vmem [shape: f32[1,64], index: 2, kind: input, shape index: {}]   ;;  %s2905_s3 = inlined_call_operand.vmem [shape: bf16[242,64], index: 3, kind: output, shape index: {}]  }
   0x1   :  { %v2115_v0 = vld [vmem:[%s2902_s1] sm:$0x3f]   ;;  %v2118_v4 = vld [vmem:[%s2903_s0 + $0x8] sm:$0xff]   ;;  %v2120_v6 = vld [vmem:[%s2903_s0 + $0x10] sm:$0xff]  }
   0x2   :  { %v2116_v1 = vld [vmem:[%s2903_s0] sm:$0xff]   ;;  %2111 = vmatprep.subr.msk.bf16.mxu0 %vm180_vm0, %v2115_v0  ;;  %2112 = vmatprep.subr.msk.bf16.mxu1 %vm180_vm0, %v2115_v0  ;;  %v182_v2 = vsel %vm180_vm0, %v2115_v0, 0  ;;  %v2121_v7 = vld [vmem:[%s2903_s0 + $0x8c] sm:$0xff]   ;;  %v2122_v8 = vld [vmem:[%s2903_s0 + $0x18] sm:$0xff]  }
   0x3   :  { %v2117_v3 = vld [vmem:[%s2903_s0 + $0x7c] sm:$0xff]   ;;  %1976 = vmatpush3.bf16.msra.mxu0 %v182_v2  ;;  %2010 = vmatpush3.bf16.msra.mxu1 %v182_v2  ;;  %v2119_v5 = vld [vmem:[%s2903_s0 + $0x84] sm:$0xff]   ;;  %v2123_v9 = vld [vmem:[%s2903_s0 + $0x94] sm:$0xff]  }
   0x4   :  { %1977 = vmatprep.mubr.msk.bf16.mxu0 %vm131_vm1, %v2116_v1  ;;  %2011 = vmatprep.mubr.msk.bf16.mxu1 %vm131_vm1, %v2117_v3  ;;  %v2124_v10 = vld [vmem:[%s2903_s0 + $0x20] sm:$0xff]   ;;  %v2126_v12 = vld [vmem:[%s2903_s0 + $0x28] sm:$0xff]   ;;  %v2128_v14 = vld [vmem:[%s2903_s0 + $0x30] sm:$0xff]  }
   0x5   :  { %2113 = vmatprep.subr.msk.bf16.mxu0 %vm180_vm0, %v2115_v0  ;;  %2114 = vmatprep.subr.msk.bf16.mxu1 %vm180_vm0, %v2115_v0  ;;  %v2125_v11 = vld [vmem:[%s2903_s0 + $0x9c] sm:$0xff]   ;;  %v2127_v13 = vld [vmem:[%s2903_s0 + $0xa4] sm:$0xff]   ;;  %v2129_v15 = vld [vmem:[%s2903_s0 + $0xac] sm:$0xff]  }
   0x6   :  { %1978 = vmatmul.mubr.msk.bf16.vlgmr.msra.gmra.mrb[0].mxu0 %vm131_vm1, %v2118_v4  ;;  %2012 = vmatmul.mubr.msk.bf16.vlgmr.msra.gmra.mrb[0].mxu1 %vm131_vm1, %v2119_v5  ;;  %v2130_v16 = vld [vmem:[%s2903_s0 + $0x38] sm:$0xff]   ;;  %v2132_v18 = vld [vmem:[%s2903_s0 + $0x40] sm:$0xff]   ;;  %v2134_v20 = vld [vmem:[%s2903_s0 + $0x48] sm:$0xff]  }
   0x7   :  { %2044 = vmatpush3.bf16.msra.mxu0 %v182_v2  ;;  %2078 = vmatpush3.bf16.msra.mxu1 %v182_v2  ;;  %v2131_v17 = vld [vmem:[%s2903_s0 + $0xb4] sm:$0xff]   ;;  %v2133_v19 = vld [vmem:[%s2903_s0 + $0xbc] sm:$0xff]   ;;  %v2135_v21 = vld [vmem:[%s2903_s0 + $0xc4] sm:$0xff]  }
   0x8   :  { %1981 = vmatprep.mubr.msk.bf16.mxu0 %vm131_vm1, %v2120_v6  ;;  %2015 = vmatprep.mubr.msk.bf16.mxu1 %vm131_vm1, %v2121_v7  ;;  %v2136_v22 = vld [vmem:[%s2903_s0 + $0x50] sm:$0xff]   ;;  %v2138_v24 = vld [vmem:[%s2903_s0 + $0x58] sm:$0xff]   ;;  %v2140_v26 = vld [vmem:[%s2903_s0 + $0x60] sm:$0xff]  }
   0x9   :  { %v2137_v23 = vld [vmem:[%s2903_s0 + $0xcc] sm:$0xff]   ;;  %v2139_v25 = vld [vmem:[%s2903_s0 + $0xd4] sm:$0xff]   ;;  %v2141_v27 = vld [vmem:[%s2903_s0 + $0xdc] sm:$0xff]  }
   0xa   :  { %v2142_v28 = vld [vmem:[%s2903_s0 + $0x68] sm:$0xff]   ;;  %v2144_v30 = vld [vmem:[%s2903_s0 + $0x70] sm:$0xff]   ;;  %v2146_v32 = vld [vmem:[%s2903_s0 + $0x78] ss:$0 sps:$4 sm:$0x11]  }
   0xb   :  { %v2143_v29 = vld [vmem:[%s2903_s0 + $0xe4] sm:$0xff]   ;;  %v2145_v31 = vld [vmem:[%s2903_s0 + $0xec] sm:$0xff]   ;;  %v2147_v33 = vld [vmem:[%s2903_s0 + $0xf4] ss:$0 sps:$4 sm:$0x11]  }
   0xc   :  { %v2148_v34 = vld [vmem:[%s2903_s0 + $0xf8] sm:$0xff]   ;;  %v2150_v36 = vld [vmem:[%s2903_s0 + $0x100] sm:$0xff]   ;;  %v2152_v38 = vld [vmem:[%s2903_s0 + $0x108] sm:$0xff]  }
   0xd   :  { %v2149_v35 = vld [vmem:[%s2903_s0 + $0x174] sm:$0xff]   ;;  %v2151_v37 = vld [vmem:[%s2903_s0 + $0x17c] sm:$0xff]   ;;  %v2153_v39 = vld [vmem:[%s2903_s0 + $0x184] sm:$0xff]  }
   0xe   :  { %1982 = vmatmul.mubr.msk.bf16.gmra.mrb[4].mxu0 %vm131_vm1, %v2122_v8  ;;  %2016 = vmatmul.mubr.msk.bf16.gmra.mrb[4].mxu1 %vm131_vm1, %v2123_v9  ;;  %v2154_v40 = vld [vmem:[%s2903_s0 + $0x110] sm:$0xff]   ;;  %v2156_v42 = vld [vmem:[%s2903_s0 + $0x118] sm:$0xff]   ;;  %v2158_v44 = vld [vmem:[%s2903_s0 + $0x120] sm:$0xff]  }
   0xf   :  { %1985 = vmatprep.mubr.msk.bf16.mxu0 %vm131_vm1, %v2124_v10  ;;  %2019 = vmatprep.mubr.msk.bf16.mxu1 %vm131_vm1, %v2125_v11  ;;  %v2155_v41 = vld [vmem:[%s2903_s0 + $0x18c] sm:$0xff]   ;;  %v2157_v43 = vld [vmem:[%s2903_s0 + $0x194] sm:$0xff]   ;;  %v2159_v45 = vld [vmem:[%s2903_s0 + $0x19c] sm:$0xff]  }
  0x10   :  { %v2160_v46 = vld [vmem:[%s2903_s0 + $0x128] sm:$0xff]   ;;  %v2162_v48 = vld [vmem:[%s2903_s0 + $0x130] sm:$0xff]   ;;  %v2164_v50 = vld [vmem:[%s2903_s0 + $0x138] sm:$0xff]  }
  0x11   :  { %v2161_v47 = vld [vmem:[%s2903_s0 + $0x1a4] sm:$0xff]   ;;  %v2163_v49 = vld [vmem:[%s2903_s0 + $0x1ac] sm:$0xff]   ;;  %v2165_v51 = vld [vmem:[%s2903_s0 + $0x1b4] sm:$0xff]  }
  0x12   :  { %v2166_v52 = vld [vmem:[%s2903_s0 + $0x140] sm:$0xff]   ;;  %v2168_v54 = vld [vmem:[%s2903_s0 + $0x148] sm:$0xff]   ;;  %v2170_v56 = vld [vmem:[%s2903_s0 + $0x150] sm:$0xff]  }
  0x13   :  { %v2167_v53 = vld [vmem:[%s2903_s0 + $0x1bc] sm:$0xff]   ;;  %v2169_v55 = vld [vmem:[%s2903_s0 + $0x1c4] sm:$0xff]   ;;  %v2171_v57 = vld [vmem:[%s2903_s0 + $0x1cc] sm:$0xff]  }
  0x14   :  { %v2172_v58 = vld [vmem:[%s2903_s0 + $0x158] sm:$0xff]   ;;  %v2174_v60 = vld [vmem:[%s2903_s0 + $0x160] sm:$0xff]   ;;  %v2176_v62 = vld [vmem:[%s2903_s0 + $0x168] sm:$0xff]  }
  0x15   :  { %v2173_v59 = vld [vmem:[%s2903_s0 + $0x1d4] sm:$0xff]   ;;  %v2175_v61 = vld [vmem:[%s2903_s0 + $0x1dc] sm:$0xff]   ;;  %v2177_v63 = vld [vmem:[%s2903_s0 + $0x1e4] sm:$0xff]  }
  0x16   :  { %1986 = vmatmul.mubr.msk.bf16.gmra.mrb[8].mxu0 %vm131_vm1, %v2126_v12  ;;  %2020 = vmatmul.mubr.msk.bf16.gmra.mrb[8].mxu1 %vm131_vm1, %v2127_v13  ;;  %v2178_v0 = vld [vmem:[%s2903_s0 + $0x170] ss:$0 sps:$4 sm:$0x11]   ;;  %v2179_v1 = vld [vmem:[%s2903_s0 + $0x1ec] ss:$0 sps:$4 sm:$0x11]  }
  0x17   :  { %1989 = vmatprep.mubr.msk.bf16.mxu0 %vm131_vm1, %v2128_v14  ;;  %2023 = vmatprep.mubr.msk.bf16.mxu1 %vm131_vm1, %v2129_v15 }
  0x1e   :  { %1990 = vmatmul.mubr.msk.bf16.gmra.mrb[12].mxu0 %vm131_vm1, %v2130_v16  ;;  %2024 = vmatmul.mubr.msk.bf16.gmra.mrb[12].mxu1 %vm131_vm1, %v2131_v17 }
  0x1f   :  { %1993 = vmatprep.mubr.msk.bf16.mxu0 %vm131_vm1, %v2132_v18  ;;  %2027 = vmatprep.mubr.msk.bf16.mxu1 %vm131_vm1, %v2133_v19 }
  0x26   :  { %1994 = vmatmul.mubr.msk.bf16.gmra.mrb[16].mxu0 %vm131_vm1, %v2134_v20  ;;  %2028 = vmatmul.mubr.msk.bf16.gmra.mrb[16].mxu1 %vm131_vm1, %v2135_v21 }
  0x27   :  { %1997 = vmatprep.mubr.msk.bf16.mxu0 %vm131_vm1, %v2136_v22  ;;  %2031 = vmatprep.mubr.msk.bf16.mxu1 %vm131_vm1, %v2137_v23 }
  0x2e   :  { %1998 = vmatmul.mubr.msk.bf16.gmra.mrb[20].mxu0 %vm131_vm1, %v2138_v24  ;;  %2032 = vmatmul.mubr.msk.bf16.gmra.mrb[20].mxu1 %vm131_vm1, %v2139_v25 }
  0x2f   :  { %2001 = vmatprep.mubr.msk.bf16.mxu0 %vm131_vm1, %v2140_v26  ;;  %2035 = vmatprep.mubr.msk.bf16.mxu1 %vm131_vm1, %v2141_v27 }
  0x36   :  { %2002 = vmatmul.mubr.msk.bf16.gmra.mrb[24].mxu0 %vm131_vm1, %v2142_v28  ;;  %2036 = vmatmul.mubr.msk.bf16.gmra.mrb[24].mxu1 %vm131_vm1, %v2143_v29 }
  0x37   :  { %2005 = vmatprep.mubr.msk.bf16.mxu0 %vm131_vm1, %v2144_v30  ;;  %2039 = vmatprep.mubr.msk.bf16.mxu1 %vm131_vm1, %v2145_v31 }
  0x3e   :  { %2006 = vmatmul.mubr.msk.bf16.gmra.mrb[28].mxu0 %vm131_vm1, %v2146_v32  ;;  %2040 = vmatmul.mubr.msk.bf16.gmra.mrb[28].mxu1 %vm131_vm1, %v2147_v33 }
  0x3f   :  { %2045 = vmatprep.mubr.msk.bf16.mxu0 %vm131_vm1, %v2148_v34  ;;  %2079 = vmatprep.mubr.msk.bf16.mxu1 %vm131_vm1, %v2149_v35 }
  0x46   :  { %2046 = vmatmul.mubr.msk.bf16.vlgmr.msra.gmra.mrb[32].mxu0 %vm131_vm1, %v2150_v36  ;;  %2080 = vmatmul.mubr.msk.bf16.vlgmr.msra.gmra.mrb[32].mxu1 %vm131_vm1, %v2151_v37 }
  0x47   :  { %2049 = vmatprep.mubr.msk.bf16.mxu0 %vm131_vm1, %v2152_v38  ;;  %2083 = vmatprep.mubr.msk.bf16.mxu1 %vm131_vm1, %v2153_v39 }
  0x4e   :  { %2050 = vmatmul.mubr.msk.bf16.gmra.mrb[36].mxu0 %vm131_vm1, %v2154_v40  ;;  %2084 = vmatmul.mubr.msk.bf16.gmra.mrb[36].mxu1 %vm131_vm1, %v2155_v41 }
  0x4f   :  { %2053 = vmatprep.mubr.msk.bf16.mxu0 %vm131_vm1, %v2156_v42  ;;  %2087 = vmatprep.mubr.msk.bf16.mxu1 %vm131_vm1, %v2157_v43 }
  0x56   :  { %2054 = vmatmul.mubr.msk.bf16.gmra.mrb[40].mxu0 %vm131_vm1, %v2158_v44  ;;  %2088 = vmatmul.mubr.msk.bf16.gmra.mrb[40].mxu1 %vm131_vm1, %v2159_v45 }
  0x57   :  { %2057 = vmatprep.mubr.msk.bf16.mxu0 %vm131_vm1, %v2160_v46  ;;  %2091 = vmatprep.mubr.msk.bf16.mxu1 %vm131_vm1, %v2161_v47 }
  0x5e   :  { %2058 = vmatmul.mubr.msk.bf16.gmra.mrb[44].mxu0 %vm131_vm1, %v2162_v48  ;;  %2092 = vmatmul.mubr.msk.bf16.gmra.mrb[44].mxu1 %vm131_vm1, %v2163_v49 }
  0x5f   :  { %2061 = vmatprep.mubr.msk.bf16.mxu0 %vm131_vm1, %v2164_v50  ;;  %2095 = vmatprep.mubr.msk.bf16.mxu1 %vm131_vm1, %v2165_v51 }
  0x66   :  { %2062 = vmatmul.mubr.msk.bf16.gmra.mrb[48].mxu0 %vm131_vm1, %v2166_v52  ;;  %2096 = vmatmul.mubr.msk.bf16.gmra.mrb[48].mxu1 %vm131_vm1, %v2167_v53 }
  0x67   :  { %2065 = vmatprep.mubr.msk.bf16.mxu0 %vm131_vm1, %v2168_v54  ;;  %2099 = vmatprep.mubr.msk.bf16.mxu1 %vm131_vm1, %v2169_v55 }
  0x6e   :  { %2066 = vmatmul.mubr.msk.bf16.gmra.mrb[52].mxu0 %vm131_vm1, %v2170_v56  ;;  %2100 = vmatmul.mubr.msk.bf16.gmra.mrb[52].mxu1 %vm131_vm1, %v2171_v57 }
  0x6f   :  { %2069 = vmatprep.mubr.msk.bf16.mxu0 %vm131_vm1, %v2172_v58  ;;  %2103 = vmatprep.mubr.msk.bf16.mxu1 %vm131_vm1, %v2173_v59 }
  0x76   :  { %2070 = vmatmul.mubr.msk.bf16.gmra.mrb[56].mxu0 %vm131_vm1, %v2174_v60  ;;  %2104 = vmatmul.mubr.msk.bf16.gmra.mrb[56].mxu1 %vm131_vm1, %v2175_v61 }
  0x77   :  { %2073 = vmatprep.mubr.msk.bf16.mxu0 %vm131_vm1, %v2176_v62  ;;  %2107 = vmatprep.mubr.msk.bf16.mxu1 %vm131_vm1, %v2177_v63 }
  0x7e   :  { %2074 = vmatmul.mubr.msk.bf16.gmra.mrb[60].mxu0 %vm131_vm1, %v2178_v0  ;;  %2108 = vmatmul.mubr.msk.bf16.gmra.mrb[60].mxu1 %vm131_vm1, %v2179_v1 }
  0xd9   :  { %v2464_v2 = vpop.f32.mrb[0].mxu0  ;;  %v2466_v3 = vpop.f32.mrb[0].mxu1 }
  0xda   :  { %v2470_v5 = vpop.f32.mrb[1].mxu0  ;;  %v2472_v6 = vpop.f32.mrb[1].mxu1  ;;  %v2936_v61 = vmax.f32 %v2464_v2, %v2466_v3 }
  0xdb   :  { %v2476_v8 = vpop.f32.mrb[2].mxu0  ;;  %v2478_v9 = vpop.f32.mrb[2].mxu1 }
  0xdc   :  { %v2482_v11 = vpop.f32.mrb[3].mxu0  ;;  %v2484_v12 = vpop.f32.mrb[3].mxu1 }
  0xe1   :  { %v2488_v14 = vpop.f32.mrb[4].mxu0  ;;  %v2490_v15 = vpop.f32.mrb[4].mxu1 }
  0xe2   :  { %v2494_v17 = vpop.f32.mrb[5].mxu0  ;;  %v2496_v18 = vpop.f32.mrb[5].mxu1 }
  0xe3   :  { %v2500_v20 = vpop.f32.mrb[6].mxu0  ;;  %v2502_v21 = vpop.f32.mrb[6].mxu1 }
  0xe4   :  { %v2506_v23 = vpop.f32.mrb[7].mxu0  ;;  %v2508_v24 = vpop.f32.mrb[7].mxu1 }
  0xe9   :  { %v2512_v26 = vpop.f32.mrb[8].mxu0  ;;  %v2514_v27 = vpop.f32.mrb[8].mxu1 }
  0xea   :  { %v2518_v29 = vpop.f32.mrb[9].mxu0  ;;  %v2520_v30 = vpop.f32.mrb[9].mxu1 }
  0xeb   :  { %v2524_v32 = vpop.f32.mrb[10].mxu0  ;;  %v2526_v33 = vpop.f32.mrb[10].mxu1 }
  0xec   :  { %v2530_v35 = vpop.f32.mrb[11].mxu0  ;;  %v2532_v36 = vpop.f32.mrb[11].mxu1 }
  0xf1   :  { %v2536_v38 = vpop.f32.mrb[12].mxu0  ;;  %v2538_v39 = vpop.f32.mrb[12].mxu1 }
  0xf2   :  { %v2542_v41 = vpop.f32.mrb[13].mxu0  ;;  %v2544_v42 = vpop.f32.mrb[13].mxu1 }
  0xf3   :  { %v2548_v44 = vpop.f32.mrb[14].mxu0  ;;  %v2550_v45 = vpop.f32.mrb[14].mxu1 }
  0xf4   :  { %v2554_v47 = vpop.f32.mrb[15].mxu0  ;;  %v2556_v48 = vpop.f32.mrb[15].mxu1 }
  0xf9   :  { %v2560_v50 = vpop.f32.mrb[16].mxu0  ;;  %v2562_v51 = vpop.f32.mrb[16].mxu1 }
  0xfa   :  { %v2566_v53 = vpop.f32.mrb[17].mxu0  ;;  %v2568_v54 = vpop.f32.mrb[17].mxu1 }
  0xfb   :  { %v2572_v56 = vpop.f32.mrb[18].mxu0  ;;  %v2574_v57 = vpop.f32.mrb[18].mxu1 }
  0xfc   :  { %v2578_v59 = vpop.f32.mrb[19].mxu0  ;;  %v2580_v60 = vpop.f32.mrb[19].mxu1 }
 0x101   :  { %v2584_v62 = vpop.f32.mrb[20].mxu0  ;;  %v2586_v63 = vpop.f32.mrb[20].mxu1 }
 0x102   :  { %v2590_v1 = vpop.f32.mrb[21].mxu0  ;;  %v2592_v55 = vpop.f32.mrb[21].mxu1 }
 0x103   :  { %v2596_v52 = vpop.f32.mrb[22].mxu0  ;;  %v2598_v49 = vpop.f32.mrb[22].mxu1 }
 0x104   :  { %v2602_v46 = vpop.f32.mrb[23].mxu0  ;;  %v2604_v43 = vpop.f32.mrb[23].mxu1 }
 0x105   :  { %2921 = vst [vmem:[#allocation2_spill] sm:$0xff] %v2604_v43 }
 0x109   :  { %v2608_v40 = vpop.f32.mrb[24].mxu0  ;;  %v2610_v37 = vpop.f32.mrb[24].mxu1 }
 0x10a   :  { %2922 = vst [vmem:[#allocation3_spill] sm:$0xff] %v2608_v40  ;;  %2923 = vst [vmem:[#allocation4_spill] sm:$0xff] %v2610_v37  ;;  %v2614_v34 = vpop.f32.mrb[25].mxu0  ;;  %v2616_v31 = vpop.f32.mrb[25].mxu1 }
 0x10b   :  { %2924 = vst [vmem:[#allocation5_spill] sm:$0xff] %v2614_v34  ;;  %2925 = vst [vmem:[#allocation6_spill] sm:$0xff] %v2616_v31  ;;  %v2620_v28 = vpop.f32.mrb[26].mxu0  ;;  %v2622_v25 = vpop.f32.mrb[26].mxu1 }
 0x10c   :  { %2926 = vst [vmem:[#allocation7_spill] sm:$0xff] %v2620_v28  ;;  %2927 = vst [vmem:[#allocation8_spill] sm:$0xff] %v2622_v25  ;;  %v2626_v22 = vpop.f32.mrb[27].mxu0  ;;  %v2628_v19 = vpop.f32.mrb[27].mxu1 }
 0x10d   :  { %2928 = vst [vmem:[#allocation9_spill] sm:$0xff] %v2626_v22  ;;  %2929 = vst [vmem:[#allocation10_spill] sm:$0xff] %v2628_v19 }
 0x111   :  { %v2632_v16 = vpop.f32.mrb[28].mxu0  ;;  %v2634_v13 = vpop.f32.mrb[28].mxu1 }
 0x112   :  { %2930 = vst [vmem:[#allocation11_spill] sm:$0xff] %v2632_v16  ;;  %2931 = vst [vmem:[#allocation12_spill] sm:$0xff] %v2634_v13  ;;  %v2638_v10 = vpop.f32.mrb[29].mxu0  ;;  %v2640_v7 = vpop.f32.mrb[29].mxu1 }
 0x113   :  { %2932 = vst [vmem:[#allocation13_spill] sm:$0xff] %v2638_v10  ;;  %2933 = vst [vmem:[#allocation14_spill] sm:$0xff] %v2640_v7  ;;  %v2008_v4 = vpop.f32.mrb[30].mxu0  ;;  %v2042_v25 = vpop.f32.mrb[30].mxu1 }
 0x114   :  { %v2644_v28 = vpop.f32.mrb[31].mxu0  ;;  %v2646_v31 = vpop.f32.mrb[31].mxu1  ;;  %v2656_v4 = vld [vmem:[%s2904_s2] ss:$0 sm:$0xff]  ;;  %v2937_v25 = vmax.f32 %v2470_v5, %v2472_v6 }
 0x115   :  { %2934 = vst [vmem:[#allocation15_spill] sm:$0xff] %v2644_v28  ;;  %2935 = vst [vmem:[#allocation16_spill] sm:$0xff] %v2646_v31  ;;  %v2938_v31 = vmax.f32 %v2476_v8, %v2478_v9 }
 0x119   :  { %v2047_v19 = vpop.f32.mrb[32].mxu0  ;;  %v2081_v22 = vpop.f32.mrb[32].mxu1 }
 0x11a   :  { %v1013_v13 = vmax.f32 %v2936_v61, %v2047_v19  ;;  %v885_v16 = vpop.f32.mrb[33].mxu0  ;;  %v1234_v34 = vpop.f32.mrb[33].mxu1  ;;  %v2939_v61 = vmax.f32 %v2482_v11, %v2484_v12  ;;  %v2940_v11 = vmax.f32 %v2488_v14, %v2490_v15  ;;  %v2942_v14 = vmax.f32 %v2500_v20, %v2502_v21 }
 0x11b   :  { %v1011_v0 = vmax.f32 %v2937_v25, %v885_v16  ;;  %v2048_v7 = vpop.f32.mrb[34].mxu0  ;;  %v2082_v10 = vpop.f32.mrb[34].mxu1 }
 0x11c   :  { %v1362_v58 = vmax.f32 %v1013_v13, %v2081_v22  ;;  %v1014_v28 = vmax.f32 %v2938_v31, %v2048_v7  ;;  %v888_v2 = vpop.f32.mrb[35].mxu0  ;;  %v1237_v3 = vpop.f32.mrb[35].mxu1 }
 0x11d   :  { %v1360_v19 = vmax.f32 %v1011_v0, %v1234_v34  ;;  %v1012_v37 = vmax.f32 %v2939_v61, %v888_v2 }
 0x11e   :  { %v1400_v40 = vadd.f32 %v2656_v4, %v1362_v58  ;;  %v1363_v43 = vmax.f32 %v1014_v28, %v2082_v10 }
 0x11f   :  { %v1398_v5 = vadd.f32 %v2656_v4, %v1360_v19  ;;  %v1361_v6 = vmax.f32 %v1012_v37, %v1237_v3  ;;  %v2941_v37 = vmax.f32 %v2494_v17, %v2496_v18 }
 0x120   :  { %v1431_v16 = vmax.f32 %v1400_v40, 0.0  ;;  %v1401_v13 = vadd.f32 %v2656_v4, %v1363_v43 }
 0x121   :  { %v1429_v22 = vmax.f32 %v1398_v5, 0.0  ;;  %v1399_v7 = vadd.f32 %v2656_v4, %v1361_v6  ;;  %v2051_v8 = vpop.f32.mrb[36].mxu0  ;;  %v2085_v9 = vpop.f32.mrb[36].mxu1  ;;  %v2943_v5 = vmax.f32 %v2506_v23, %v2508_v24 }
 0x122   :  { %v1878_v31 = vpack.c.bf16 %v1431_v16, %v1431_v16  ;;  %v1432_v34 = vmax.f32 %v1401_v13, 0.0  ;;  %v1017_v12 = vmax.f32 %v2940_v11, %v2051_v8  ;;  %v901_v58 = vpop.f32.mrb[37].mxu0  ;;  %v1250_v10 = vpop.f32.mrb[37].mxu1  ;;  %v2944_v11 = vmax.f32 %v2512_v26, %v2514_v27 }
 0x123   :  { %v1876_v28 = vpack.c.bf16 %v1429_v22, %v1429_v22  ;;  %v1430_v0 = vmax.f32 %v1399_v7, 0.0  ;;  %v1015_v40 = vmax.f32 %v2941_v37, %v901_v58  ;;  %v2052_v43 = vpop.f32.mrb[38].mxu0  ;;  %v2086_v25 = vpop.f32.mrb[38].mxu1  ;;  %v2945_v37 = vmax.f32 %v2518_v29, %v2520_v30 }
 0x124   :  { %1588 = vst.msk [vmem:[%s2905_s3 + $0x8] sm:$0xf] %vm1585_vm2, %v1878_v31  ;;  %v1879_v2 = vpack.c.bf16 %v1432_v34, %v1432_v34  ;;  %v1366_v3 = vmax.f32 %v1017_v12, %v2085_v9  ;;  %v1018_v15 = vmax.f32 %v2942_v14, %v2052_v43  ;;  %v904_v19 = vpop.f32.mrb[39].mxu0  ;;  %v1253_v61 = vpop.f32.mrb[39].mxu1  ;;  %v2946_v26 = vmax.f32 %v2524_v32, %v2526_v33 }
 0x125   :  { %1586 = vst.msk [vmem:[%s2905_s3] sm:$0xf] %vm1585_vm2, %v1876_v28  ;;  %v1877_v17 = vpack.c.bf16 %v1430_v0, %v1430_v0  ;;  %v1364_v18 = vmax.f32 %v1015_v40, %v1250_v10  ;;  %v1016_v6 = vmax.f32 %v2943_v5, %v904_v19  ;;  %v2947_v19 = vmax.f32 %v2530_v35, %v2532_v36 }
 0x126   :  { %1589 = vst.msk [vmem:[%s2905_s3 + $0xc] sm:$0xf] %vm1585_vm2, %v1879_v2  ;;  %v1404_v20 = vadd.f32 %v2656_v4, %v1366_v3  ;;  %v1367_v21 = vmax.f32 %v1018_v15, %v2086_v25 }
 0x127   :  { %1587 = vst.msk [vmem:[%s2905_s3 + $0x4] sm:$0xf] %vm1585_vm2, %v1877_v17  ;;  %v1402_v16 = vadd.f32 %v2656_v4, %v1364_v18  ;;  %v1365_v13 = vmax.f32 %v1016_v6, %v1253_v61 }
 0x128   :  { %v1435_v22 = vmax.f32 %v1404_v20, 0.0  ;;  %v1405_v23 = vadd.f32 %v2656_v4, %v1367_v21 }
 0x129   :  { %v1433_v24 = vmax.f32 %v1402_v16, 0.0  ;;  %v1403_v7 = vadd.f32 %v2656_v4, %v1365_v13  ;;  %v2055_v8 = vpop.f32.mrb[40].mxu0  ;;  %v2089_v9 = vpop.f32.mrb[40].mxu1 }
 0x12a   :  { %v1882_v31 = vpack.c.bf16 %v1435_v22, %v1435_v22  ;;  %v1436_v34 = vmax.f32 %v1405_v23, 0.0  ;;  %v1021_v12 = vmax.f32 %v2944_v11, %v2055_v8  ;;  %v917_v58 = vpop.f32.mrb[41].mxu0  ;;  %v1266_v10 = vpop.f32.mrb[41].mxu1  ;;  %v2948_v22 = vmax.f32 %v2536_v38, %v2538_v39 }
 0x12b   :  { %v1880_v28 = vpack.c.bf16 %v1433_v24, %v1433_v24  ;;  %v1434_v0 = vmax.f32 %v1403_v7, 0.0  ;;  %v1019_v40 = vmax.f32 %v2945_v37, %v917_v58  ;;  %v2056_v43 = vpop.f32.mrb[42].mxu0  ;;  %v2090_v25 = vpop.f32.mrb[42].mxu1  ;;  %v2950_v38 = vmax.f32 %v2548_v44, %v2550_v45 }
 0x12c   :  { %1592 = vst.msk [vmem:[%s2905_s3 + $0x18] sm:$0xf] %vm1585_vm2, %v1882_v31  ;;  %v1883_v2 = vpack.c.bf16 %v1436_v34, %v1436_v34  ;;  %v1370_v3 = vmax.f32 %v1021_v12, %v2089_v9  ;;  %v1022_v27 = vmax.f32 %v2946_v26, %v2056_v43  ;;  %v920_v14 = vpop.f32.mrb[43].mxu0  ;;  %v1269_v15 = vpop.f32.mrb[43].mxu1  ;;  %v2949_v31 = vmax.f32 %v2542_v41, %v2544_v42 }
 0x12d   :  { %1590 = vst.msk [vmem:[%s2905_s3 + $0x10] sm:$0xf] %vm1585_vm2, %v1880_v28  ;;  %v1881_v29 = vpack.c.bf16 %v1434_v0, %v1434_v0  ;;  %v1368_v30 = vmax.f32 %v1019_v40, %v1266_v10  ;;  %v1020_v61 = vmax.f32 %v2947_v19, %v920_v14  ;;  %v2951_v37 = vmax.f32 %v2554_v47, %v2556_v48 }
 0x12e   :  { %1593 = vst.msk [vmem:[%s2905_s3 + $0x1c] sm:$0xf] %vm1585_vm2, %v1883_v2  ;;  %v1408_v32 = vadd.f32 %v2656_v4, %v1370_v3  ;;  %v1371_v33 = vmax.f32 %v1022_v27, %v2090_v25 }
 0x12f   :  { %1591 = vst.msk [vmem:[%s2905_s3 + $0x14] sm:$0xf] %vm1585_vm2, %v1881_v29  ;;  %v1406_v17 = vadd.f32 %v2656_v4, %v1368_v30  ;;  %v1369_v18 = vmax.f32 %v1020_v61, %v1269_v15  ;;  %v2952_v29 = vmax.f32 %v2560_v50, %v2562_v51  ;;  %v2954_v50 = vmax.f32 %v2572_v56, %v2574_v57 }
 0x130   :  { %v1439_v5 = vmax.f32 %v1408_v32, 0.0  ;;  %v1409_v35 = vadd.f32 %v2656_v4, %v1371_v33 }
 0x131   :  { %v1437_v36 = vmax.f32 %v1406_v17, 0.0  ;;  %v1407_v6 = vadd.f32 %v2656_v4, %v1369_v18  ;;  %v2059_v20 = vpop.f32.mrb[44].mxu0  ;;  %v2093_v21 = vpop.f32.mrb[44].mxu1  ;;  %v2953_v17 = vmax.f32 %v2566_v53, %v2568_v54 }
 0x132   :  { %v1886_v16 = vpack.c.bf16 %v1439_v5, %v1439_v5  ;;  %v1440_v13 = vmax.f32 %v1409_v35, 0.0  ;;  %v1025_v23 = vmax.f32 %v2948_v22, %v2059_v20  ;;  %v933_v24 = vpop.f32.mrb[45].mxu0  ;;  %v1282_v7 = vpop.f32.mrb[45].mxu1 }
 0x133   :  { %v1884_v8 = vpack.c.bf16 %v1437_v36, %v1437_v36  ;;  %v1438_v9 = vmax.f32 %v1407_v6, 0.0  ;;  %v1023_v34 = vmax.f32 %v2949_v31, %v933_v24  ;;  %v2060_v11 = vpop.f32.mrb[46].mxu0  ;;  %v2094_v12 = vpop.f32.mrb[46].mxu1 }
 0x134   :  { %1596 = vst.msk [vmem:[%s2905_s3 + $0x28] sm:$0xf] %vm1585_vm2, %v1886_v16  ;;  %v1887_v58 = vpack.c.bf16 %v1440_v13, %v1440_v13  ;;  %v1374_v10 = vmax.f32 %v1025_v23, %v2093_v21  ;;  %v1026_v39 = vmax.f32 %v2950_v38, %v2060_v11  ;;  %v936_v28 = vpop.f32.mrb[47].mxu0  ;;  %v1285_v0 = vpop.f32.mrb[47].mxu1  ;;  %v2955_v16 = vmax.f32 %v2578_v59, %v2580_v60 }
 0x135   :  { %1594 = vst.msk [vmem:[%s2905_s3 + $0x20] sm:$0xf] %vm1585_vm2, %v1884_v8  ;;  %v1885_v41 = vpack.c.bf16 %v1438_v9, %v1438_v9  ;;  %v1372_v42 = vmax.f32 %v1023_v34, %v1282_v7  ;;  %v1024_v40 = vmax.f32 %v2951_v37, %v936_v28  ;;  %v2956_v11 = vmax.f32 %v2584_v62, %v2586_v63 }
 0x136   :  { %1597 = vst.msk [vmem:[%s2905_s3 + $0x2c] sm:$0xf] %vm1585_vm2, %v1887_v58  ;;  %v1412_v44 = vadd.f32 %v2656_v4, %v1374_v10  ;;  %v1375_v45 = vmax.f32 %v1026_v39, %v2094_v12  ;;  %v2957_v28 = vmax.f32 %v2590_v1, %v2592_v55  ;;  %v2958_v62 = vmax.f32 %v2596_v52, %v2598_v49 }
 0x137   :  { %1595 = vst.msk [vmem:[%s2905_s3 + $0x24] sm:$0xf] %vm1585_vm2, %v1885_v41  ;;  %v1410_v43 = vadd.f32 %v2656_v4, %v1372_v42  ;;  %v1373_v25 = vmax.f32 %v1024_v40, %v1285_v0 }
 0x138   :  { %v1443_v2 = vmax.f32 %v1412_v44, 0.0  ;;  %v1413_v47 = vadd.f32 %v2656_v4, %v1375_v45 }
 0x139   :  { %v1441_v48 = vmax.f32 %v1410_v43, 0.0  ;;  %v1411_v3 = vadd.f32 %v2656_v4, %v1373_v25  ;;  %v2063_v26 = vpop.f32.mrb[48].mxu0  ;;  %v2097_v27 = vpop.f32.mrb[48].mxu1  ;;  %v2959_v43 = vld [vmem:[#allocation2_spill] sm:$0xff] }
 0x13a   :  { %v1890_v14 = vpack.c.bf16 %v1443_v2, %v1443_v2  ;;  %v1444_v15 = vmax.f32 %v1413_v47, 0.0  ;;  %v1029_v30 = vmax.f32 %v2952_v29, %v2063_v26  ;;  %v949_v19 = vpop.f32.mrb[49].mxu0  ;;  %v1298_v61 = vpop.f32.mrb[49].mxu1  ;;  %v2960_v25 = vmax.f32 %v2602_v46, %v2959_v43  ;;  %v2976_v43 = vld [vmem:[#allocation13_spill] sm:$0xff] }
 0x13b   :  { %v1888_v32 = vpack.c.bf16 %v1441_v48, %v1441_v48  ;;  %v1442_v33 = vmax.f32 %v1411_v3, 0.0  ;;  %v1027_v18 = vmax.f32 %v2953_v17, %v949_v19  ;;  %v2064_v5 = vpop.f32.mrb[50].mxu0  ;;  %v2098_v35 = vpop.f32.mrb[50].mxu1  ;;  %v2961_v19 = vld [vmem:[#allocation3_spill] sm:$0xff] }
 0x13c   :  { %1600 = vst.msk [vmem:[%s2905_s3 + $0x38] sm:$0xf] %vm1585_vm2, %v1890_v14  ;;  %v1891_v36 = vpack.c.bf16 %v1444_v15, %v1444_v15  ;;  %v1378_v6 = vmax.f32 %v1029_v30, %v2097_v27  ;;  %v1030_v51 = vmax.f32 %v2954_v50, %v2064_v5  ;;  %v952_v20 = vpop.f32.mrb[51].mxu0  ;;  %v1301_v21 = vpop.f32.mrb[51].mxu1 }
 0x13d   :  { %1598 = vst.msk [vmem:[%s2905_s3 + $0x30] sm:$0xf] %vm1585_vm2, %v1888_v32  ;;  %v1889_v53 = vpack.c.bf16 %v1442_v33, %v1442_v33  ;;  %v1376_v54 = vmax.f32 %v1027_v18, %v1298_v61  ;;  %v1028_v13 = vmax.f32 %v2955_v16, %v952_v20  ;;  %v2962_v61 = vld [vmem:[#allocation4_spill] sm:$0xff]  ;;  %v2967_v16 = vld [vmem:[#allocation7_spill] sm:$0xff] }
 0x13e   :  { %1601 = vst.msk [vmem:[%s2905_s3 + $0x3c] sm:$0xf] %vm1585_vm2, %v1891_v36  ;;  %v1416_v56 = vadd.f32 %v2656_v4, %v1378_v6  ;;  %v1379_v57 = vmax.f32 %v1030_v51, %v2098_v35  ;;  %v2963_v32 = vmax.f32 %v2961_v19, %v2962_v61  ;;  %v2964_v36 = vld [vmem:[#allocation5_spill] sm:$0xff]  ;;  %v2965_v6 = vld [vmem:[#allocation6_spill] sm:$0xff] }
 0x13f   :  { %1599 = vst.msk [vmem:[%s2905_s3 + $0x34] sm:$0xf] %vm1585_vm2, %v1889_v53  ;;  %v1414_v22 = vadd.f32 %v2656_v4, %v1376_v54  ;;  %v1377_v23 = vmax.f32 %v1028_v13, %v1301_v21  ;;  %v2966_v50 = vmax.f32 %v2964_v36, %v2965_v6  ;;  %v2968_v13 = vld [vmem:[#allocation8_spill] sm:$0xff] }
 0x140   :  { %v1447_v24 = vmax.f32 %v1416_v56, 0.0  ;;  %v1417_v59 = vadd.f32 %v2656_v4, %v1379_v57  ;;  %v2969_v56 = vmax.f32 %v2967_v16, %v2968_v13 }
 0x141   :  { %v1445_v60 = vmax.f32 %v1414_v22, 0.0  ;;  %v1415_v7 = vadd.f32 %v2656_v4, %v1377_v23  ;;  %v2067_v8 = vpop.f32.mrb[52].mxu0  ;;  %v2101_v9 = vpop.f32.mrb[52].mxu1 }
 0x142   :  { %v1894_v31 = vpack.c.bf16 %v1447_v24, %v1447_v24  ;;  %v1448_v34 = vmax.f32 %v1417_v59, 0.0  ;;  %v1033_v12 = vmax.f32 %v2956_v11, %v2067_v8  ;;  %v965_v58 = vpop.f32.mrb[53].mxu0  ;;  %v1314_v10 = vpop.f32.mrb[53].mxu1 }
 0x143   :  { %v1892_v38 = vpack.c.bf16 %v1445_v60, %v1445_v60  ;;  %v1446_v39 = vmax.f32 %v1415_v7, 0.0  ;;  %v1031_v0 = vmax.f32 %v2957_v28, %v965_v58  ;;  %v2068_v41 = vpop.f32.mrb[54].mxu0  ;;  %v2102_v42 = vpop.f32.mrb[54].mxu1  ;;  %v2970_v60 = vld [vmem:[#allocation9_spill] sm:$0xff]  ;;  %v2971_v7 = vld [vmem:[#allocation10_spill] sm:$0xff] }
 0x144   :  { %1604 = vst.msk [vmem:[%s2905_s3 + $0x48] sm:$0xf] %vm1585_vm2, %v1894_v31  ;;  %v1895_v37 = vpack.c.bf16 %v1448_v34, %v1448_v34  ;;  %v1382_v40 = vmax.f32 %v1033_v12, %v2101_v9  ;;  %v1034_v63 = vmax.f32 %v2958_v62, %v2068_v41  ;;  %v968_v44 = vpop.f32.mrb[55].mxu0  ;;  %v1317_v45 = vpop.f32.mrb[55].mxu1  ;;  %v2972_v8 = vmax.f32 %v2970_v60, %v2971_v7 }
 0x145   :  { %1602 = vst.msk [vmem:[%s2905_s3 + $0x40] sm:$0xf] %vm1585_vm2, %v1892_v38  ;;  %v1893_v55 = vpack.c.bf16 %v1446_v39, %v1446_v39  ;;  %v1380_v1 = vmax.f32 %v1031_v0, %v1314_v10  ;;  %v1032_v2 = vmax.f32 %v2960_v25, %v968_v44  ;;  %v2977_v25 = vld [vmem:[#allocation14_spill] sm:$0xff] }
 0x146   :  { %1605 = vst.msk [vmem:[%s2905_s3 + $0x4c] sm:$0xf] %vm1585_vm2, %v1895_v37  ;;  %v1420_v49 = vadd.f32 %v2656_v4, %v1382_v40  ;;  %v1383_v52 = vmax.f32 %v1034_v63, %v2102_v42  ;;  %v2973_v37 = vld [vmem:[#allocation11_spill] sm:$0xff]  ;;  %v2974_v40 = vld [vmem:[#allocation12_spill] sm:$0xff] }
 0x147   :  { %1603 = vst.msk [vmem:[%s2905_s3 + $0x44] sm:$0xf] %vm1585_vm2, %v1893_v55  ;;  %v1418_v47 = vadd.f32 %v2656_v4, %v1380_v1  ;;  %v1381_v48 = vmax.f32 %v1032_v2, %v1317_v45  ;;  %v2975_v62 = vmax.f32 %v2973_v37, %v2974_v40  ;;  %v2978_v2 = vmax.f32 %v2976_v43, %v2977_v25 }
 0x148   :  { %v1451_v3 = vmax.f32 %v1420_v49, 0.0  ;;  %v1421_v46 = vadd.f32 %v2656_v4, %v1383_v52 }
 0x149   :  { %v1449_v26 = vmax.f32 %v1418_v47, 0.0  ;;  %v1419_v27 = vadd.f32 %v2656_v4, %v1381_v48  ;;  %v2071_v14 = vpop.f32.mrb[56].mxu0  ;;  %v2105_v15 = vpop.f32.mrb[56].mxu1 }
 0x14a   :  { %v1898_v29 = vpack.c.bf16 %v1451_v3, %v1451_v3  ;;  %v1452_v30 = vmax.f32 %v1421_v46, 0.0  ;;  %v1037_v33 = vmax.f32 %v2963_v32, %v2071_v14  ;;  %v981_v17 = vpop.f32.mrb[57].mxu0  ;;  %v1330_v18 = vpop.f32.mrb[57].mxu1 }
 0x14b   :  { %v1896_v5 = vpack.c.bf16 %v1449_v26, %v1449_v26  ;;  %v1450_v35 = vmax.f32 %v1419_v27, 0.0  ;;  %v1035_v51 = vmax.f32 %v2966_v50, %v981_v17  ;;  %v2072_v20 = vpop.f32.mrb[58].mxu0  ;;  %v2106_v21 = vpop.f32.mrb[58].mxu1 }
 0x14c   :  { %1608 = vst.msk [vmem:[%s2905_s3 + $0x58] sm:$0xf] %vm1585_vm2, %v1898_v29  ;;  %v1899_v53 = vpack.c.bf16 %v1452_v30, %v1452_v30  ;;  %v1386_v54 = vmax.f32 %v1037_v33, %v2105_v15  ;;  %v1038_v57 = vmax.f32 %v2969_v56, %v2072_v20  ;;  %v984_v22 = vpop.f32.mrb[59].mxu0  ;;  %v1333_v23 = vpop.f32.mrb[59].mxu1  ;;  %v2979_v15 = vld [vmem:[#allocation15_spill] sm:$0xff]  ;;  %v2980_v29 = vld [vmem:[#allocation16_spill] sm:$0xff] }
 0x14d   :  { %1606 = vst.msk [vmem:[%s2905_s3 + $0x50] sm:$0xf] %vm1585_vm2, %v1896_v5  ;;  %v1897_v24 = vpack.c.bf16 %v1450_v35, %v1450_v35  ;;  %v1384_v59 = vmax.f32 %v1035_v51, %v1330_v18  ;;  %v1036_v9 = vmax.f32 %v2972_v8, %v984_v22  ;;  %v2981_v30 = vmax.f32 %v2979_v15, %v2980_v29 }
 0x14e   :  { %1609 = vst.msk [vmem:[%s2905_s3 + $0x5c] sm:$0xf] %vm1585_vm2, %v1899_v53  ;;  %v1424_v31 = vadd.f32 %v2656_v4, %v1386_v54  ;;  %v1387_v34 = vmax.f32 %v1038_v57, %v2106_v21 }
 0x14f   :  { %1607 = vst.msk [vmem:[%s2905_s3 + $0x54] sm:$0xf] %vm1585_vm2, %v1897_v24  ;;  %v1422_v11 = vadd.f32 %v2656_v4, %v1384_v59  ;;  %v1385_v12 = vmax.f32 %v1036_v9, %v1333_v23 }
 0x150   :  { %v1455_v58 = vmax.f32 %v1424_v31, 0.0  ;;  %v1425_v10 = vadd.f32 %v2656_v4, %v1387_v34 }
 0x151   :  { %v1453_v38 = vmax.f32 %v1422_v11, 0.0  ;;  %v1423_v39 = vadd.f32 %v2656_v4, %v1385_v12  ;;  %v2075_v28 = vpop.f32.mrb[60].mxu0  ;;  %v2109_v0 = vpop.f32.mrb[60].mxu1 }
 0x152   :  { %v1902_v41 = vpack.c.bf16 %v1455_v58, %v1455_v58  ;;  %v1456_v42 = vmax.f32 %v1425_v10, 0.0  ;;  %v1041_v63 = vmax.f32 %v2975_v62, %v2075_v28  ;;  %v997_v44 = vpop.f32.mrb[61].mxu0  ;;  %v1346_v45 = vpop.f32.mrb[61].mxu1 }
 0x153   :  { %v1900_v55 = vpack.c.bf16 %v1453_v38, %v1453_v38  ;;  %v1454_v1 = vmax.f32 %v1423_v39, 0.0  ;;  %v1039_v49 = vmax.f32 %v2978_v2, %v997_v44  ;;  %v2076_v52 = vpop.f32.mrb[62].mxu0  ;;  %v2110_v47 = vpop.f32.mrb[62].mxu1 }
 0x154   :  { %1612 = vst.msk [vmem:[%s2905_s3 + $0x68] sm:$0xf] %vm1585_vm2, %v1902_v41  ;;  %v1903_v48 = vpack.c.bf16 %v1456_v42, %v1456_v42  ;;  %v1390_v3 = vmax.f32 %v1041_v63, %v2109_v0  ;;  %v1000_v46 = vpop.f32.mrb[63].mxu0  ;;  %v1349_v26 = vpop.f32.mrb[63].mxu1 }
 0x155   :  { %1610 = vst.msk [vmem:[%s2905_s3 + $0x60] sm:$0xf] %vm1585_vm2, %v1900_v55  ;;  %v1901_v27 = vpack.c.bf16 %v1454_v1, %v1454_v1  ;;  %v1388_v14 = vmax.f32 %v1039_v49, %v1346_v45  ;;  %v1040_v19 = vmax.f32 %v2981_v30, %v1000_v46 }
 0x156   :  { %1613 = vst.msk [vmem:[%s2905_s3 + $0x6c] sm:$0xf] %vm1585_vm2, %v1903_v48  ;;  %v1428_v61 = vadd.f32 %v2656_v4, %v1390_v3 }
 0x157   :  { %1611 = vst.msk [vmem:[%s2905_s3 + $0x64] sm:$0xf] %vm1585_vm2, %v1901_v27  ;;  %v1426_v32 = vadd.f32 %v2656_v4, %v1388_v14  ;;  %v1389_v33 = vmax.f32 %v1040_v19, %v1349_v26 }
 0x158   :  { %v1459_v17 = vmax.f32 %v1428_v61, 0.0 }
 0x159   :  { %v1457_v18 = vmax.f32 %v1426_v32, 0.0  ;;  %v1427_v5 = vadd.f32 %v2656_v4, %v1389_v33 }
 0x15a   :  { %v1906_v35 = vpack.c.bf16 %v1459_v17, %v1459_v17 }
 0x15b   :  { %v1904_v36 = vpack.c.bf16 %v1457_v18, %v1457_v18  ;;  %v1458_v6 = vmax.f32 %v1427_v5, 0.0 }
 0x15c   :  { %1617 = vst.msk [vmem:[%s2905_s3 + $0x78] sm:$0x1] %vm1616_vm3, %v1906_v35 }
 0x15d   :  { %1614 = vst.msk [vmem:[%s2905_s3 + $0x70] sm:$0xf] %vm1585_vm2, %v1904_v36  ;;  %v1905_v50 = vpack.c.bf16 %v1458_v6, %v1458_v6 }
 0x15f   :  { %1615 = vst.msk [vmem:[%s2905_s3 + $0x74] sm:$0xf] %vm1585_vm2, %v1905_v50 }

// kernel: cnn_forward.4
= control target key start
LH: loop header
LB: loop body
LE: loop exit
PB: predicated region body
PF: predicated region fallthrough
CT: control target
= control target key end

     0   :  { %vm649_vm0 = vcmask 257024   ;;  %vm656_vm1 = vcmask 253952   ;;  %s1268_s1 = inlined_call_operand.vmem [shape: bf16[256,32], index: 1, kind: input, shape index: {}]   ;;  %s1269_s0 = inlined_call_operand.vmem [shape: bf16[4,50,256], index: 0, kind: input, shape index: {}]   ;;  %s1270_s2 = inlined_call_operand.vmem [shape: f32[1,32], index: 2, kind: input, shape index: {}]   ;;  %s1271_s3 = inlined_call_operand.vmem [shape: bf16[50,32], index: 3, kind: output, shape index: {}]  }
   0x1   :  { %v906_v0 = vld [vmem:[%s1268_s1 + $0x40] sm:$0xff]   ;;  %v908_v2 = vld [vmem:[%s1268_s1 + $0x48] sm:$0xff]   ;;  %v910_v4 = vld [vmem:[%s1268_s1 + $0x50] sm:$0xff]  }
   0x2   :  { %v907_v1 = vld [vmem:[%s1268_s1] sm:$0xff]   ;;  %746 = vmatprep.subr.bf16.mxu0 %v906_v0  ;;  %786 = vmatprep.subr.bf16.mxu1 %v906_v0  ;;  %v909_v3 = vld [vmem:[%s1268_s1 + $0x8] sm:$0xff]   ;;  %v1004_v5 = vld [vmem:[%s1268_s1 + $0x10] sm:$0xff]  }
   0x3   :  { %747 = vmatpush3.bf16.msra.mxu0 %v907_v1  ;;  %787 = vmatpush3.bf16.msra.mxu1 %v907_v1  ;;  %v1009_v6 = vld [vmem:[%s1268_s1 + $0x58] sm:$0xff]   ;;  %v1023_v8 = vld [vmem:[%s1268_s1 + $0x60] sm:$0xff]   ;;  %v1037_v10 = vld [vmem:[%s1268_s1 + $0x68] sm:$0xff]  }
   0x4   :  { %748 = vmatprep.subr.bf16.mxu0 %v908_v2  ;;  %788 = vmatprep.subr.bf16.mxu1 %v908_v2  ;;  %v1016_v7 = vld [vmem:[%s1268_s1 + $0x18] sm:$0xff]   ;;  %v1030_v9 = vld [vmem:[%s1268_s1 + $0x20] sm:$0xff]   ;;  %v1050_v13 = vld [vmem:[%s1268_s1 + $0x28] sm:$0xff]  }
   0x5   :  { %v924_v11 = vld [vmem:[%s1269_s0 + $0x4] ss:$8 sps:$4 sm:$0xff]   ;;  %v1057_v14 = vld [vmem:[%s1268_s1 + $0x70] sm:$0xff]   ;;  %v1071_v16 = vld [vmem:[%s1268_s1 + $0x78] sm:$0xff]  }
   0x6   :  { %v927_v12 = vld [vmem:[%s1269_s0 + $0x3c] ss:$8 sps:$4 sm:$0xff]   ;;  %219 = vmatprep.mubr.bf16.mxu0 %v924_v11  ;;  %v1064_v15 = vld [vmem:[%s1268_s1 + $0x30] sm:$0xff]   ;;  %v922_v18 = vld [vmem:[%s1269_s0] ss:$8 sps:$4 sm:$0xff]  }
   0x7   :  { %749 = vmatpush3.bf16.msra.mxu0 %v909_v3  ;;  %789 = vmatpush3.bf16.msra.mxu1 %v909_v3  ;;  %v1078_v17 = vld [vmem:[%s1268_s1 + $0x38] sm:$0xff]   ;;  %v930_v21 = vld [vmem:[%s1269_s0 + $0x4c] ss:$8 sps:$4 sm:$0xff]   ;;  %v933_v23 = vld [vmem:[%s1269_s0 + $0x48] ss:$8 sps:$4 sm:$0xff]  }
   0x8   :  { %750 = vmatprep.subr.bf16.mxu0 %v910_v4  ;;  %790 = vmatprep.subr.bf16.mxu1 %v910_v4  ;;  %v925_v19 = vld [vmem:[%s1269_s0 + $0x38] ss:$8 sps:$4 sm:$0xff]   ;;  %v928_v20 = vld [vmem:[%s1269_s0 + $0x14] ss:$8 sps:$4 sm:$0xff]   ;;  %v934_v24 = vld [vmem:[%s1269_s0 + $0x24] ss:$8 sps:$4 sm:$0xff]  }
   0x9   :  { %328 = vmatprep.mubr.bf16.mxu1 %v927_v12  ;;  %v932_v22 = vld [vmem:[%s1269_s0 + $0x10] ss:$8 sps:$4 sm:$0xff]   ;;  %v936_v25 = vld [vmem:[%s1269_s0 + $0x5c] ss:$8 sps:$4 sm:$0xff]   ;;  %v938_v26 = vld [vmem:[%s1269_s0 + $0x20] ss:$8 sps:$4 sm:$0xff]  }
   0xa   :  { %v939_v27 = vld [vmem:[%s1269_s0 + $0x58] ss:$8 sps:$4 sm:$0xff]   ;;  %v53_v28 = vld [vmem:[%s1269_s0 + $0x30] sm:$0x11]  ;;  %v692_v29 = vld [vmem:[%s1269_s0 + $0x68] sm:$0x11] }
   0xb   :  { %751 = vmatpush3.bf16.msra.mxu0 %v1004_v5  ;;  %791 = vmatpush3.bf16.msra.mxu1 %v1004_v5  ;;  %v669_v30 = vcombine.high %v53_v28, %v53_v28  ;;  %v700_v31 = vcombine.high %v692_v29, %v692_v29  ;;  %v668_v32 = vcombine.low %v53_v28, %v53_v28  ;;  %v946_v34 = vld [vmem:[%s1269_s0 + $0x74] ss:$8 sps:$4 sm:$0xff]   ;;  %v944_v36 = vld [vmem:[%s1269_s0 + $0x70] ss:$8 sps:$4 sm:$0xff]   ;;  %v950_v38 = vld [vmem:[%s1269_s0 + $0x84] ss:$8 sps:$4 sm:$0xff]  }
   0xc   :  { %752 = vmatprep.subr.bf16.mxu0 %v1009_v6  ;;  %792 = vmatprep.subr.bf16.mxu1 %v1009_v6  ;;  %v699_v33 = vcombine.low %v692_v29, %v692_v29  ;;  %v949_v35 = vld [vmem:[%s1269_s0 + $0xac] ss:$8 sps:$4 sm:$0xff]   ;;  %v947_v37 = vld [vmem:[%s1269_s0 + $0xa8] ss:$8 sps:$4 sm:$0xff]   ;;  %v952_v39 = vld [vmem:[%s1269_s0 + $0xbc] ss:$8 sps:$4 sm:$0xff]  }
   0xd   :  { %v954_v40 = vld [vmem:[%s1269_s0 + $0x80] ss:$8 sps:$4 sm:$0xff]   ;;  %v956_v42 = vld [vmem:[%s1269_s0 + $0x94] ss:$8 sps:$4 sm:$0xff]   ;;  %v960_v46 = vld [vmem:[%s1269_s0 + $0x90] ss:$8 sps:$4 sm:$0xff]  }
   0xe   :  { %v955_v41 = vld [vmem:[%s1269_s0 + $0xb8] ss:$8 sps:$4 sm:$0xff]   ;;  %v958_v43 = vld [vmem:[%s1269_s0 + $0xcc] ss:$8 sps:$4 sm:$0xff]   ;;  %v961_v47 = vld [vmem:[%s1269_s0 + $0xc8] ss:$8 sps:$4 sm:$0xff]  }
   0xf   :  { %753 = vmatpush3.bf16.msra.mxu0 %v1016_v7  ;;  %793 = vmatpush3.bf16.msra.mxu1 %v1016_v7  ;;  %v707_v44 = vld [vmem:[%s1269_s0 + $0xa0] sm:$0x11]  ;;  %v722_v45 = vld [vmem:[%s1269_s0 + $0xd8] sm:$0x11] }
  0x10   :  { %754 = vmatprep.subr.bf16.mxu0 %v1023_v8  ;;  %794 = vmatprep.subr.bf16.mxu1 %v1023_v8  ;;  %v715_v48 = vcombine.high %v707_v44, %v707_v44  ;;  %v730_v49 = vcombine.high %v722_v45, %v722_v45  ;;  %v714_v50 = vcombine.low %v707_v44, %v707_v44 }
  0x11   :  { %v729_v51 = vcombine.low %v722_v45, %v722_v45 }
  0x13   :  { %755 = vmatpush3.bf16.msra.mxu0 %v1030_v9  ;;  %795 = vmatpush3.bf16.msra.mxu1 %v1030_v9 }
  0x14   :  { %756 = vmatprep.subr.bf16.mxu0 %v1037_v10  ;;  %796 = vmatprep.subr.bf16.mxu1 %v1037_v10 }
  0x17   :  { %757 = vmatpush3.bf16.msra.mxu0 %v1050_v13  ;;  %797 = vmatpush3.bf16.msra.mxu1 %v1050_v13 }
  0x18   :  { %758 = vmatprep.subr.bf16.mxu0 %v1057_v14  ;;  %798 = vmatprep.subr.bf16.mxu1 %v1057_v14 }
  0x1b   :  { %759 = vmatpush3.bf16.msra.mxu0 %v1064_v15  ;;  %799 = vmatpush3.bf16.msra.mxu1 %v1064_v15 }
  0x1c   :  { %760 = vmatprep.subr.bf16.mxu0 %v1071_v16  ;;  %800 = vmatprep.subr.bf16.mxu1 %v1071_v16 }
  0x1f   :  { %761 = vmatpush3.bf16.msra.mxu0 %v1078_v17  ;;  %801 = vmatpush3.bf16.msra.mxu1 %v1078_v17 }
  0x20   :  { %826 = vmatprep.subr.bf16.mxu0 %v906_v0  ;;  %866 = vmatprep.subr.bf16.mxu1 %v906_v0 }
  0x22   :  { %220 = vmatmul.mubr.bf16.vlgmr.msra.gmra.mrb[0].mxu0 %v922_v18  ;;  %329 = vmatmul.mubr.bf16.vlgmr.msra.gmra.mrb[0].mxu1 %v925_v19 }
  0x23   :  { %827 = vmatpush3.bf16.msra.mxu0 %v907_v1  ;;  %867 = vmatpush3.bf16.msra.mxu1 %v907_v1 }
  0x24   :  { %828 = vmatprep.subr.bf16.mxu0 %v908_v2  ;;  %868 = vmatprep.subr.bf16.mxu1 %v908_v2 }
  0x25   :  { %227 = vmatprep.mubr.bf16.mxu0 %v928_v20  ;;  %336 = vmatprep.mubr.bf16.mxu1 %v930_v21 }
  0x27   :  { %829 = vmatpush3.bf16.msra.mxu0 %v909_v3  ;;  %869 = vmatpush3.bf16.msra.mxu1 %v909_v3 }
  0x28   :  { %830 = vmatprep.subr.bf16.mxu0 %v910_v4  ;;  %870 = vmatprep.subr.bf16.mxu1 %v910_v4 }
  0x2a   :  { %228 = vmatmul.mubr.bf16.gmra.mrb[4].mxu0 %v932_v22  ;;  %337 = vmatmul.mubr.bf16.gmra.mrb[4].mxu1 %v933_v23 }
  0x2b   :  { %831 = vmatpush3.bf16.msra.mxu0 %v1004_v5  ;;  %871 = vmatpush3.bf16.msra.mxu1 %v1004_v5 }
  0x2c   :  { %832 = vmatprep.subr.bf16.mxu0 %v1009_v6  ;;  %872 = vmatprep.subr.bf16.mxu1 %v1009_v6 }
  0x2d   :  { %235 = vmatprep.mubr.bf16.mxu0 %v934_v24  ;;  %344 = vmatprep.mubr.bf16.mxu1 %v936_v25 }
  0x2f   :  { %833 = vmatpush3.bf16.msra.mxu0 %v1016_v7  ;;  %873 = vmatpush3.bf16.msra.mxu1 %v1016_v7 }
  0x30   :  { %834 = vmatprep.subr.bf16.mxu0 %v1023_v8  ;;  %874 = vmatprep.subr.bf16.mxu1 %v1023_v8 }
  0x32   :  { %236 = vmatmul.mubr.bf16.gmra.mrb[8].mxu0 %v938_v26  ;;  %345 = vmatmul.mubr.bf16.gmra.mrb[8].mxu1 %v939_v27 }
  0x33   :  { %835 = vmatpush3.bf16.msra.mxu0 %v1030_v9  ;;  %875 = vmatpush3.bf16.msra.mxu1 %v1030_v9 }
  0x34   :  { %836 = vmatprep.subr.bf16.mxu0 %v1037_v10  ;;  %876 = vmatprep.subr.bf16.mxu1 %v1037_v10 }
  0x35   :  { %243 = vmatprep.mubr.bf16.mxu0 %v669_v30  ;;  %352 = vmatprep.mubr.bf16.mxu1 %v700_v31 }
  0x37   :  { %837 = vmatpush3.bf16.msra.mxu0 %v1050_v13  ;;  %877 = vmatpush3.bf16.msra.mxu1 %v1050_v13 }
  0x38   :  { %838 = vmatprep.subr.bf16.mxu0 %v1057_v14  ;;  %878 = vmatprep.subr.bf16.mxu1 %v1057_v14 }
  0x3a   :  { %244 = vmatmul.mubr.bf16.gmra.mrb[12].mxu0 %v668_v32  ;;  %353 = vmatmul.mubr.bf16.gmra.mrb[12].mxu1 %v699_v33 }
  0x3b   :  { %839 = vmatpush3.bf16.msra.mxu0 %v1064_v15  ;;  %879 = vmatpush3.bf16.msra.mxu1 %v1064_v15 }
  0x3c   :  { %840 = vmatprep.subr.bf16.mxu0 %v1071_v16  ;;  %880 = vmatprep.subr.bf16.mxu1 %v1071_v16 }
  0x3d   :  { %444 = vmatprep.mubr.bf16.mxu0 %v946_v34  ;;  %560 = vmatprep.mubr.bf16.mxu1 %v949_v35 }
  0x3f   :  { %841 = vmatpush3.bf16.msra.mxu0 %v1078_v17  ;;  %881 = vmatpush3.bf16.msra.mxu1 %v1078_v17 }
  0x42   :  { %445 = vmatmul.mubr.bf16.vlgmr.msra.gmra.mrb[16].mxu0 %v944_v36  ;;  %561 = vmatmul.mubr.bf16.vlgmr.msra.gmra.mrb[16].mxu1 %v947_v37 }
  0x43   :  { %452 = vmatprep.mubr.bf16.mxu0 %v950_v38  ;;  %568 = vmatprep.mubr.bf16.mxu1 %v952_v39 }
  0x4a   :  { %453 = vmatmul.mubr.bf16.gmra.mrb[20].mxu0 %v954_v40  ;;  %569 = vmatmul.mubr.bf16.gmra.mrb[20].mxu1 %v955_v41 }
  0x4b   :  { %460 = vmatprep.mubr.bf16.mxu0 %v956_v42  ;;  %576 = vmatprep.mubr.bf16.mxu1 %v958_v43 }
  0x52   :  { %461 = vmatmul.mubr.bf16.gmra.mrb[24].mxu0 %v960_v46  ;;  %577 = vmatmul.mubr.bf16.gmra.mrb[24].mxu1 %v961_v47 }
  0x53   :  { %468 = vmatprep.mubr.bf16.mxu0 %v715_v48  ;;  %584 = vmatprep.mubr.bf16.mxu1 %v730_v49 }
  0x5a   :  { %469 = vmatmul.mubr.bf16.gmra.mrb[28].mxu0 %v714_v50  ;;  %585 = vmatmul.mubr.bf16.gmra.mrb[28].mxu1 %v729_v51 }
  0xf5   :  { %v762_v52 = vpop.f32.mrb[0].mxu0  ;;  %v802_v53 = vpop.f32.mrb[0].mxu1 }
  0xf6   :  { %v763_v54 = vpop.f32.mrb[1].mxu0  ;;  %v803_v55 = vpop.f32.mrb[1].mxu1 }
  0xf7   :  { %v764_v56 = vadd.f32 %v763_v54, %v762_v52  ;;  %v804_v57 = vadd.f32 %v803_v55, %v802_v53  ;;  %v765_v58 = vpop.f32.mrb[2].mxu0  ;;  %v805_v59 = vpop.f32.mrb[2].mxu1  ;;  %v1217_v54 = vld [vmem:[%s1270_s2] ss:$0 sm:$0xff] }
  0xf8   :  { %v766_v60 = vpop.f32.mrb[3].mxu0  ;;  %v806_v61 = vpop.f32.mrb[3].mxu1 }
  0xf9   :  { %v360_v62 = vmax.f32 %v764_v56, %v804_v57  ;;  %v767_v63 = vadd.f32 %v766_v60, %v765_v58  ;;  %v807_v0 = vadd.f32 %v806_v61, %v805_v59 }
  0xfb   :  { %v361_v1 = vmax.f32 %v767_v63, %v807_v0 }
  0xfd   :  { %v768_v2 = vpop.f32.mrb[4].mxu0  ;;  %v808_v3 = vpop.f32.mrb[4].mxu1 }
  0xfe   :  { %v769_v4 = vpop.f32.mrb[5].mxu0  ;;  %v809_v5 = vpop.f32.mrb[5].mxu1 }
  0xff   :  { %v1184_v6 = vadd.f32 %v769_v4, %v768_v2  ;;  %v1186_v7 = vadd.f32 %v809_v5, %v808_v3  ;;  %v771_v8 = vpop.f32.mrb[6].mxu0  ;;  %v811_v9 = vpop.f32.mrb[6].mxu1 }
 0x100   :  { %v772_v10 = vpop.f32.mrb[7].mxu0  ;;  %v812_v11 = vpop.f32.mrb[7].mxu1 }
 0x101   :  { %v362_v12 = vmax.f32 %v1184_v6, %v1186_v7  ;;  %v1190_v13 = vadd.f32 %v772_v10, %v771_v8  ;;  %v1192_v14 = vadd.f32 %v812_v11, %v811_v9 }
 0x103   :  { %v363_v15 = vmax.f32 %v1190_v13, %v1192_v14 }
 0x105   :  { %v774_v16 = vpop.f32.mrb[8].mxu0  ;;  %v814_v17 = vpop.f32.mrb[8].mxu1 }
 0x106   :  { %v775_v18 = vpop.f32.mrb[9].mxu0  ;;  %v815_v19 = vpop.f32.mrb[9].mxu1 }
 0x107   :  { %v1196_v20 = vadd.f32 %v775_v18, %v774_v16  ;;  %v1198_v21 = vadd.f32 %v815_v19, %v814_v17  ;;  %v777_v22 = vpop.f32.mrb[10].mxu0  ;;  %v817_v23 = vpop.f32.mrb[10].mxu1 }
 0x108   :  { %v778_v24 = vpop.f32.mrb[11].mxu0  ;;  %v818_v25 = vpop.f32.mrb[11].mxu1 }
 0x109   :  { %v364_v26 = vmax.f32 %v1196_v20, %v1198_v21  ;;  %v1202_v27 = vadd.f32 %v778_v24, %v777_v22  ;;  %v1204_v28 = vadd.f32 %v818_v25, %v817_v23 }
 0x10b   :  { %v365_v29 = vmax.f32 %v1202_v27, %v1204_v28 }
 0x10d   :  { %v780_v30 = vpop.f32.mrb[12].mxu0  ;;  %v820_v31 = vpop.f32.mrb[12].mxu1 }
 0x10e   :  { %v781_v32 = vpop.f32.mrb[13].mxu0  ;;  %v821_v33 = vpop.f32.mrb[13].mxu1 }
 0x10f   :  { %v1208_v34 = vadd.f32 %v781_v32, %v780_v30  ;;  %v1210_v35 = vadd.f32 %v821_v33, %v820_v31  ;;  %v783_v36 = vpop.f32.mrb[14].mxu0  ;;  %v823_v37 = vpop.f32.mrb[14].mxu1 }
 0x110   :  { %v784_v38 = vpop.f32.mrb[15].mxu0  ;;  %v824_v39 = vpop.f32.mrb[15].mxu1 }
 0x111   :  { %v366_v40 = vmax.f32 %v1208_v34, %v1210_v35 }
 0x115   :  { %v842_v41 = vpop.f32.mrb[16].mxu0  ;;  %v882_v42 = vpop.f32.mrb[16].mxu1 }
 0x116   :  { %v843_v43 = vpop.f32.mrb[17].mxu0  ;;  %v883_v44 = vpop.f32.mrb[17].mxu1 }
 0x117   :  { %v844_v45 = vadd.f32 %v843_v43, %v842_v41  ;;  %v884_v46 = vadd.f32 %v883_v44, %v882_v42  ;;  %v845_v47 = vpop.f32.mrb[18].mxu0  ;;  %v885_v48 = vpop.f32.mrb[18].mxu1 }
 0x118   :  { %v846_v49 = vpop.f32.mrb[19].mxu0  ;;  %v886_v50 = vpop.f32.mrb[19].mxu1 }
 0x119   :  { %v476_v51 = vmax.f32 %v360_v62, %v844_v45  ;;  %v847_v52 = vadd.f32 %v846_v49, %v845_v47  ;;  %v887_v53 = vadd.f32 %v886_v50, %v885_v48 }
 0x11b   :  { %v592_v55 = vmax.f32 %v476_v51, %v884_v46  ;;  %v477_v56 = vmax.f32 %v361_v1, %v847_v52 }
 0x11d   :  { %v606_v57 = vadd.f32 %v1217_v54, %v592_v55  ;;  %v593_v58 = vmax.f32 %v477_v56, %v887_v53  ;;  %v848_v59 = vpop.f32.mrb[20].mxu0  ;;  %v888_v60 = vpop.f32.mrb[20].mxu1 }
 0x11e   :  { %v849_v61 = vpop.f32.mrb[21].mxu0  ;;  %v889_v63 = vpop.f32.mrb[21].mxu1 }
 0x11f   :  { %v613_v0 = vmax.f32 %v606_v57, 0.0  ;;  %v607_v2 = vadd.f32 %v1217_v54, %v593_v58  ;;  %v850_v62 = vadd.f32 %v849_v61, %v848_v59  ;;  %v890_v3 = vadd.f32 %v889_v63, %v888_v60  ;;  %v851_v4 = vpop.f32.mrb[22].mxu0  ;;  %v891_v5 = vpop.f32.mrb[22].mxu1 }
 0x120   :  { %v852_v8 = vpop.f32.mrb[23].mxu0  ;;  %v892_v9 = vpop.f32.mrb[23].mxu1 }
 0x121   :  { %v739_v10 = vpack.c.bf16 %v613_v0, %v613_v0  ;;  %v614_v11 = vmax.f32 %v607_v2, 0.0  ;;  %v478_v1 = vmax.f32 %v362_v12, %v850_v62  ;;  %v853_v16 = vadd.f32 %v852_v8, %v851_v4 }
 0x122   :  { %v893_v17 = vadd.f32 %v892_v9, %v891_v5 }
 0x123   :  { %650 = vst.msk [vmem:[%s1271_s3] sm:$0xf] %vm649_vm0, %v739_v10  ;;  %v740_v18 = vpack.c.bf16 %v614_v11, %v614_v11  ;;  %v594_v19 = vmax.f32 %v478_v1, %v890_v3  ;;  %v479_v22 = vmax.f32 %v363_v15, %v853_v16 }
 0x125   :  { %651 = vst.msk [vmem:[%s1271_s3 + $0x4] sm:$0xf] %vm649_vm0, %v740_v18  ;;  %v608_v6 = vadd.f32 %v1217_v54, %v594_v19  ;;  %v595_v7 = vmax.f32 %v479_v22, %v893_v17  ;;  %v854_v12 = vpop.f32.mrb[24].mxu0  ;;  %v894_v23 = vpop.f32.mrb[24].mxu1 }
 0x126   :  { %v855_v24 = vpop.f32.mrb[25].mxu0  ;;  %v895_v25 = vpop.f32.mrb[25].mxu1 }
 0x127   :  { %v615_v30 = vmax.f32 %v608_v6, 0.0  ;;  %v609_v31 = vadd.f32 %v1217_v54, %v595_v7  ;;  %v856_v32 = vadd.f32 %v855_v24, %v854_v12  ;;  %v896_v33 = vadd.f32 %v895_v25, %v894_v23  ;;  %v857_v36 = vpop.f32.mrb[26].mxu0  ;;  %v897_v13 = vpop.f32.mrb[26].mxu1 }
 0x128   :  { %v858_v14 = vpop.f32.mrb[27].mxu0  ;;  %v898_v15 = vpop.f32.mrb[27].mxu1 }
 0x129   :  { %v741_v37 = vpack.c.bf16 %v615_v30, %v615_v30  ;;  %v616_v38 = vmax.f32 %v609_v31, 0.0  ;;  %v480_v39 = vmax.f32 %v364_v26, %v856_v32  ;;  %v859_v41 = vadd.f32 %v858_v14, %v857_v36 }
 0x12a   :  { %v899_v42 = vadd.f32 %v898_v15, %v897_v13 }
 0x12b   :  { %652 = vst.msk [vmem:[%s1271_s3 + $0x8] sm:$0xf] %vm649_vm0, %v741_v37  ;;  %v742_v43 = vpack.c.bf16 %v616_v38, %v616_v38  ;;  %v596_v44 = vmax.f32 %v480_v39, %v896_v33  ;;  %v481_v45 = vmax.f32 %v365_v29, %v859_v41 }
 0x12d   :  { %653 = vst.msk [vmem:[%s1271_s3 + $0xc] sm:$0xf] %vm649_vm0, %v742_v43  ;;  %v610_v20 = vadd.f32 %v1217_v54, %v596_v44  ;;  %v597_v21 = vmax.f32 %v481_v45, %v899_v42  ;;  %v860_v26 = vpop.f32.mrb[28].mxu0  ;;  %v900_v46 = vpop.f32.mrb[28].mxu1 }
 0x12e   :  { %v861_v47 = vpop.f32.mrb[29].mxu0  ;;  %v901_v48 = vpop.f32.mrb[29].mxu1 }
 0x12f   :  { %v617_v49 = vmax.f32 %v610_v20, 0.0  ;;  %v611_v50 = vadd.f32 %v1217_v54, %v597_v21  ;;  %v862_v51 = vadd.f32 %v861_v47, %v860_v26  ;;  %v902_v52 = vadd.f32 %v901_v48, %v900_v46  ;;  %v863_v53 = vpop.f32.mrb[30].mxu0  ;;  %v903_v27 = vpop.f32.mrb[30].mxu1 }
 0x130   :  { %v864_v28 = vpop.f32.mrb[31].mxu0  ;;  %v904_v29 = vpop.f32.mrb[31].mxu1 }
 0x131   :  { %v743_v55 = vpack.c.bf16 %v617_v49, %v617_v49  ;;  %v618_v56 = vmax.f32 %v611_v50, 0.0  ;;  %v482_v57 = vmax.f32 %v366_v40, %v862_v51 }
 0x133   :  { %654 = vst.msk [vmem:[%s1271_s3 + $0x10] sm:$0xf] %vm649_vm0, %v743_v55  ;;  %v744_v58 = vpack.c.bf16 %v618_v56, %v618_v56  ;;  %v598_v59 = vmax.f32 %v482_v57, %v902_v52 }
 0x135   :  { %655 = vst.msk [vmem:[%s1271_s3 + $0x14] sm:$0xf] %vm649_vm0, %v744_v58  ;;  %v612_v60 = vadd.f32 %v1217_v54, %v598_v59 }
 0x137   :  { %v619_v61 = vmax.f32 %v612_v60, 0.0 }
 0x139   :  { %v745_v63 = vpack.c.bf16 %v619_v61, %v619_v61 }
 0x13b   :  { %657 = vst.msk [vmem:[%s1271_s3 + $0x18] sm:$0x1] %vm656_vm1, %v745_v63 }

// kernel: cnn_forward.5
= control target key start
LH: loop header
LB: loop body
LE: loop exit
PB: predicated region body
PF: predicated region fallthrough
CT: control target
= control target key end

     0   :  { %v135_v29 = vlaneseq  ;;  %v982_v33 = vmov 1966171168   ;;  %v983_v40 = vmov 0.0   ;;  %vm984_vm0 = vmmov 0   ;;  %s1204_s0 = inlined_call_operand.vmem [shape: bf16[2,800], index: 0, kind: input, shape index: {}]   ;;  %s1205_s1 = inlined_call_operand.vmem [shape: bf16[800,32], index: 1, kind: input, shape index: {}]   ;;  %s1206_s2 = inlined_call_operand.vmem [shape: f32[1,32], index: 2, kind: input, shape index: {}]   ;;  %s1207_s3 = inlined_call_operand.vmem [shape: f32[32,10], index: 3, kind: input, shape index: {}]   ;;  %s1208_s4 = inlined_call_operand.vmem [shape: f32[1,10], index: 4, kind: input, shape index: {}]   ;;  %s1209_s5 = inlined_call_operand.hbm [shape: f32[2,10], index: 5, kind: output, shape index: {}]  }
   0x1   :  { %v907_v0 = vld [vmem:[%s1205_s1 + $0x40] sm:$0xff]   ;;  %v911_v4 = vld [vmem:[%s1205_s1 + $0x48] sm:$0xff]   ;;  %v915_v8 = vld [vmem:[%s1205_s1 + $0x50] sm:$0xff]   ;;  %v133_v34 = vunpack.c.l.s4 %v982_v33 }
   0x2   :  { %v908_v1 = vld [vmem:[%s1205_s1] sm:$0xff]   ;;  %803 = vmatprep.subr.bf16.mxu0 %v907_v0  ;;  %v912_v5 = vld [vmem:[%s1205_s1 + $0x8] sm:$0xff]   ;;  %v916_v9 = vld [vmem:[%s1205_s1 + $0x10] sm:$0xff]   ;;  %v136_v35 = vshrl.u32 %v135_v29, 7 }
   0x3   :  { %v909_v2 = vld [vmem:[%s1205_s1 + $0xc0] sm:$0xff]   ;;  %804 = vmatpush3.bf16.msra.mxu0 %v908_v1  ;;  %v913_v6 = vld [vmem:[%s1205_s1 + $0xc8] sm:$0xff]   ;;  %v917_v10 = vld [vmem:[%s1205_s1 + $0xd0] sm:$0xff]   ;;  %v134_v39 = vunpack.c.0.s8 %v133_v34 }
   0x4   :  { %v910_v3 = vld [vmem:[%s1205_s1 + $0x80] sm:$0xff]   ;;  %825 = vmatprep.subr.bf16.mxu1 %v909_v2  ;;  %805 = vmatprep.subr.bf16.mxu0 %v911_v4  ;;  %v914_v7 = vld [vmem:[%s1205_s1 + $0x88] sm:$0xff]   ;;  %v918_v11 = vld [vmem:[%s1205_s1 + $0x90] sm:$0xff]  }
   0x5   :  { %826 = vmatpush3.bf16.msra.mxu1 %v910_v3  ;;  %v919_v12 = vld [vmem:[%s1205_s1 + $0x58] sm:$0xff]   ;;  %v923_v16 = vld [vmem:[%s1205_s1 + $0x60] sm:$0xff]   ;;  %v927_v20 = vld [vmem:[%s1205_s1 + $0x68] sm:$0xff]   ;;  %v137_v41 = vsub.s32 %v134_v39, %v136_v35 }
   0x6   :  { %827 = vmatprep.subr.bf16.mxu1 %v913_v6  ;;  %v920_v13 = vld [vmem:[%s1205_s1 + $0x18] sm:$0xff]   ;;  %v924_v17 = vld [vmem:[%s1205_s1 + $0x20] sm:$0xff]   ;;  %v928_v21 = vld [vmem:[%s1205_s1 + $0x28] sm:$0xff]  }
   0x7   :  { %806 = vmatpush3.bf16.msra.mxu0 %v912_v5  ;;  %v921_v14 = vld [vmem:[%s1205_s1 + $0xd8] sm:$0xff]   ;;  %v925_v18 = vld [vmem:[%s1205_s1 + $0xe0] sm:$0xff]   ;;  %v929_v22 = vld [vmem:[%s1205_s1 + $0xe8] sm:$0xff]  }
   0x8   :  { %807 = vmatprep.subr.bf16.mxu0 %v915_v8  ;;  %v922_v15 = vld [vmem:[%s1205_s1 + $0x98] sm:$0xff]   ;;  %v926_v19 = vld [vmem:[%s1205_s1 + $0xa0] sm:$0xff]   ;;  %v930_v23 = vld [vmem:[%s1205_s1 + $0xa8] sm:$0xff]  }
   0x9   :  { %828 = vmatpush3.bf16.msra.mxu1 %v914_v7  ;;  %v931_v24 = vld [vmem:[%s1205_s1 + $0x70] sm:$0xff]   ;;  %v935_v28 = vld [vmem:[%s1205_s1 + $0x78] sm:$0xff]   ;;  %v22_v32 = vld [vmem:[%s1204_s0] sm:$0x7f] }
   0xa   :  { %829 = vmatprep.subr.bf16.mxu1 %v917_v10  ;;  %v932_v25 = vld [vmem:[%s1205_s1 + $0x30] sm:$0xff]   ;;  %v936_v30 = vld [vmem:[%s1205_s1 + $0x38] sm:$0xff]   ;;  %v940_v37 = vld [vmem:[%s1205_s1 + $0x140] sm:$0xff]   ;;  %v131_v38 = vcombine.high %v22_v32, %v22_v32  ;;  %v138_v42 = vrot.slane %v22_v32, %v137_v41 }
   0xb   :  { %808 = vmatpush3.bf16.msra.mxu0 %v916_v9  ;;  %v933_v26 = vld [vmem:[%s1205_s1 + $0xf0] sm:$0xff]   ;;  %v937_v31 = vld [vmem:[%s1205_s1 + $0xf8] sm:$0xff]   ;;  %v941_v48 = vld [vmem:[%s1205_s1 + $0x100] sm:$0xff]  }
   0xc   :  { %809 = vmatprep.subr.bf16.mxu0 %v919_v12  ;;  %v934_v27 = vld [vmem:[%s1205_s1 + $0xb0] sm:$0xff]   ;;  %v939_v36 = vld [vmem:[%s1205_s1 + $0xb8] sm:$0xff]   ;;  %v145_v43 = vrot.slane %v131_v38, %v137_v41  ;;  %v146_v44 = vcombine.high %v138_v42, %v138_v42  ;;  %v154_v45 = vrot.slane %v138_v42, %v137_v41  ;;  %v942_v50 = vld [vmem:[%s1205_s1 + $0x148] sm:$0xff]  }
   0xd   :  { %830 = vmatpush3.bf16.msra.mxu1 %v918_v11  ;;  %v943_v53 = vld [vmem:[%s1205_s1 + $0x108] sm:$0xff]   ;;  %v944_v54 = vld [vmem:[%s1205_s1 + $0x150] sm:$0xff]   ;;  %v954_v55 = vld [vmem:[%s1205_s1 + $0x180] sm:$0xff]  }
   0xe   :  { %831 = vmatprep.subr.bf16.mxu1 %v921_v14  ;;  %v147_v46 = vcombine.high %v145_v43, %v145_v43  ;;  %v168_v47 = vrot.slane %v146_v44, %v137_v41  ;;  %v176_v49 = vcombine.high %v154_v45, %v154_v45  ;;  %v161_v56 = vrot.slane %v145_v43, %v137_v41  ;;  %v945_v57 = vld [vmem:[%s1205_s1 + $0x110] sm:$0xff]   ;;  %v957_v58 = vld [vmem:[%s1205_s1 + $0x188] sm:$0xff]  }
   0xf   :  { %810 = vmatpush3.bf16.msra.mxu0 %v920_v13 }
  0x10   :  { %811 = vmatprep.subr.bf16.mxu0 %v923_v16  ;;  %521 = vmatprep.mubr.bf16.mxu0 %v168_v47  ;;  %v178_v51 = vcombine.high %v168_v47, %v168_v47  ;;  %v175_v52 = vrot.slane %v147_v46, %v137_v41 }
  0x11   :  { %832 = vmatpush3.bf16.msra.mxu1 %v922_v15 }
  0x12   :  { %833 = vmatprep.subr.bf16.mxu1 %v925_v18  ;;  %561 = vmatprep.mubr.bf16.mxu1 %v178_v51 }
  0x13   :  { %812 = vmatpush3.bf16.msra.mxu0 %v924_v17 }
  0x14   :  { %813 = vmatprep.subr.bf16.mxu0 %v927_v20 }
  0x15   :  { %834 = vmatpush3.bf16.msra.mxu1 %v926_v19 }
  0x16   :  { %835 = vmatprep.subr.bf16.mxu1 %v929_v22 }
  0x17   :  { %814 = vmatpush3.bf16.msra.mxu0 %v928_v21 }
  0x18   :  { %815 = vmatprep.subr.bf16.mxu0 %v931_v24 }
  0x19   :  { %836 = vmatpush3.bf16.msra.mxu1 %v930_v23 }
  0x1a   :  { %837 = vmatprep.subr.bf16.mxu1 %v933_v26 }
  0x1b   :  { %816 = vmatpush3.bf16.msra.mxu0 %v932_v25 }
  0x1c   :  { %817 = vmatprep.subr.bf16.mxu0 %v935_v28 }
  0x1d   :  { %838 = vmatpush3.bf16.msra.mxu1 %v934_v27 }
  0x1e   :  { %839 = vmatprep.subr.bf16.mxu1 %v937_v31 }
  0x1f   :  { %818 = vmatpush3.bf16.msra.mxu0 %v936_v30 }
  0x20   :  { %847 = vmatprep.subr.bf16.mxu0 %v940_v37 }
  0x21   :  { %840 = vmatpush3.bf16.msra.mxu1 %v939_v36 }
  0x22   :  { %877 = vmatprep.subr.bf16.mxu1 %v983_v40  ;;  %522 = vmatmul.mubr.bf16.vlgmr.msra.gmra.mrb[0].mxu0 %v154_v45 }
  0x23   :  { %848 = vmatpush3.bf16.msra.mxu0 %v941_v48  ;;  %601 = vmatprep.mubr.bf16.mxu0 %v175_v52 }
  0x24   :  { %562 = vmatmul.mubr.bf16.vlgmr.msra.gmra.mrb[0].mxu1 %v176_v49  ;;  %849 = vmatprep.subr.bf16.mxu0 %v942_v50 }
  0x25   :  { %881 = vmatprep.mubr.msk.bf16.mxu1 %vm984_vm0, %v983_v40  ;;  %878 = vmatpush3.bf16.msra.mxu1 %v954_v55 }
  0x26   :  { %879 = vmatprep.subr.bf16.mxu1 %v983_v40 }
  0x27   :  { %850 = vmatpush3.bf16.msra.mxu0 %v943_v53 }
  0x28   :  { %10 = vsyncpa [#allocation3], 0  ;;  %851 = vmatprep.subr.bf16.mxu0 %v944_v54  ;;  %v946_v59 = vld [vmem:[%s1205_s1 + $0x158] sm:$0xff]   ;;  %v177_v60 = vcombine.high %v161_v56, %v161_v56  ;;  %vm485_vm1 = vcmask 261120   ;;  %v948_v62 = vld [vmem:[%s1205_s1 + $0x160] sm:$0xff]   ;;  %v985_v6 = vmov 0.0|0.0  }
  0x29   :  { %880 = vmatpush3.bf16.msra.mxu1 %v957_v58  ;;  %v947_v61 = vld [vmem:[%s1205_s1 + $0x118] sm:$0xff]   ;;  %v949_v63 = vld [vmem:[%s1205_s1 + $0x120] sm:$0xff]   ;;  %v950_v0 = vld [vmem:[%s1205_s1 + $0x168] sm:$0xff]   ;;  %s986_s27 = smov [#allocation2]   ;;  %vm733_vm2 = vcmask 74752  }
  0x2a   :  { %v951_v1 = vld [vmem:[%s1205_s1 + $0x128] sm:$0xff]   ;;  %v952_v2 = vld [vmem:[%s1205_s1 + $0x170] sm:$0xff]   ;;  %v955_v4 = vld [vmem:[%s1205_s1 + $0x178] sm:$0xff]   ;;  %896 = vmatprep.subr.bf16.mxu1 %v985_v6  ;;  %s741_s28 = sshll.u32 %s986_s27, 4  ;;  %s742_s28 = int_to_ptr.vmem [resolvable:$true] %s741_s28 }
  0x2b   :  { %852 = vmatpush3.bf16.msra.mxu0 %v945_v57  ;;  %v953_v3 = vld [vmem:[%s1205_s1 + $0x130] sm:$0xff]   ;;  %v956_v5 = vld [vmem:[%s1205_s1 + $0x138] sm:$0xff]   ;;  %v649_v7 = vld [vmem:[%s1207_s3] sm:$0xff]  ;;  %s958_s29 = scalar_lea.vmem %s742_s28, 32  ;;  %p963_p1 = scmp.lt.s32.totalorder %s742_s28, %s742_s28 }
  0x2c   :  { %853 = vmatprep.subr.bf16.mxu0 %v946_v59  ;;  %882 = vmatmul.mubr.msk.bf16.vlgmr.msra.gmra.mrb[4].mxu1 %vm485_vm1, %v177_v60  ;;  %v650_v8 = vld [vmem:[%s1207_s3 + $0x8] sm:$0xff]  ;;  %v651_v10 = vld [vmem:[%s1207_s3 + $0x10] sm:$0xff]  ;;  %v652_v11 = vld [vmem:[%s1207_s3 + $0x18] sm:$0xff]  ;;  %p959_p0 = scmp.ne.s32.totalorder %s742_s28, %s958_s29  ;;  %p964_p2 = scmp.lt.s32.totalorder %s958_s29, %s958_s29 }
  0x2d   :  { %893 = vmatprep.mubr.msk.f32.mxu1 %vm984_vm0, %v983_v40  ;;  %v897_v9 = vpack.c.bf16 %v650_v8, %v649_v7  ;;  %v900_v12 = vpack.c.bf16 %v652_v11, %v651_v10  ;;  %v749_v14 = vld [vmem:[%s1206_s2] ss:$0 sm:$0xff] }
  0x2e   :  { %v801_v37 = vld [vmem:[%s1208_s4] ss:$0 sm:$0xff]  ;;  %p965_p3 = por %p964_p2, %p963_p1 }
  0x2f   :  { %854 = vmatpush3.bf16.msra.mxu0 %v947_v61  ;;  %898 = vmatpush3.bf16.msra.mxu1 %v897_v9 }
  0x30   :  { %855 = vmatprep.subr.bf16.mxu0 %v948_v62  ;;  %899 = vmatprep.subr.bf16.mxu1 %v985_v6  ;;  %p966_p4 = pnand %p965_p3, %p959_p0 }
  0x33   :  { %856 = vmatpush3.bf16.msra.mxu0 %v949_v63  ;;  %901 = vmatpush3.bf16.msra.mxu1 %v900_v12 }
  0x34   :  { %857 = vmatprep.subr.bf16.mxu0 %v950_v0 }
  0x37   :  { %858 = vmatpush3.bf16.msra.mxu0 %v951_v1 }
  0x38   :  { %859 = vmatprep.subr.bf16.mxu0 %v952_v2 }
  0x3b   :  { %860 = vmatpush3.bf16.msra.mxu0 %v953_v3 }
  0x3c   :  { %861 = vmatprep.subr.bf16.mxu0 %v955_v4 }
  0x3f   :  { %862 = vmatpush3.bf16.msra.mxu0 %v956_v5 }
  0x42   :  { %602 = vmatmul.mubr.bf16.vlgmr.msra.gmra.mrb[4].mxu0 %v161_v56 }
  0xf5   :  { %v819_v13 = vpop.f32.mrb[0].mxu0 }
  0xf6   :  { %v820_v15 = vpop.f32.mrb[1].mxu0 }
  0xf7   :  { %v821_v16 = vadd.f32 %v820_v15, %v819_v13  ;;  %v822_v17 = vpop.f32.mrb[2].mxu0  ;;  %v841_v18 = vpop.f32.mrb[0].mxu1 }
  0xf8   :  { %v823_v19 = vpop.f32.mrb[3].mxu0  ;;  %v842_v20 = vpop.f32.mrb[1].mxu1 }
  0xf9   :  { %v524_v21 = vadd.f32 %v821_v16, %v749_v14  ;;  %v843_v22 = vadd.f32 %v842_v20, %v841_v18  ;;  %v844_v23 = vpop.f32.mrb[2].mxu1 }
  0xfa   :  { %v845_v24 = vpop.f32.mrb[3].mxu1 }
  0xfb   :  { %v564_v25 = vadd.f32 %v843_v22, %v524_v21 }
  0xff   :  { %v643_v26 = vpop.f32.mrb[4].mxu1 }
 0x100   :  { %v883_v27 = vpop.f32.mrb[5].mxu1 }
 0x101   :  { %v646_v28 = vpop.f32.mrb[6].mxu1 }
 0x102   :  { %v884_v29 = vpop.f32.mrb[7].mxu1 }
 0x115   :  { %v863_v30 = vpop.f32.mrb[4].mxu0 }
 0x116   :  { %v864_v31 = vpop.f32.mrb[5].mxu0 }
 0x117   :  { %v865_v32 = vadd.f32 %v864_v31, %v863_v30  ;;  %v866_v33 = vpop.f32.mrb[6].mxu0 }
 0x118   :  { %v867_v34 = vpop.f32.mrb[7].mxu0 }
 0x119   :  { %v604_v35 = vadd.f32 %v865_v32, %v564_v25 }
 0x11b   :  { %v644_v36 = vadd.f32 %v643_v26, %v604_v35 }
 0x11d   :  { %894 = vmatmul.mubr.msk.f32.vlgmr.msra.gmra.mrb[8].mxu1 %vm485_vm1, %v644_v36 }
 0x1f0   :  { %v729_v38 = vpop.f32.mrb[8].mxu1 }
 0x1f1   :  { %v730_v39 = vadd.f32 %v801_v37, %v729_v38  ;;  %v895_v40 = vpop.f32.mrb[9].mxu1 }
 0x1f3   :  { %734 = vst.msk [vmem:[#allocation2] sm:$0x3] %vm733_vm2, %v730_v39 }
 0x1f4   :  { %969 = shalt.err (!%p966_p4)
}
 0x1f5   :  { %s970_s7 = scalar_lea.hbm %s1209_s5, 32 }
 0x1f6   :  { %p971_p5 = scmp.ne.s32.totalorder %s1209_s5, %s970_s7  ;;  %p974_p6 = scmp.lt.u32.totalorder %s970_s7, %s1209_s5 }
 0x1f8   :  { %p976_p7 = pnand %p974_p6, %p971_p5 }
 0x1fa   :  { %979 = shalt.err (!%p976_p7)
}
 0x1fb   :  { %744 = dma.vmem_to_hbm [thread:$0]  %s742_s28, 32, %s1209_s5, [#allocation3]  }
 0x1fc   :  { %980 = dma.done.wait [#allocation3], 32  }
 0x1fd   :  { %981 = vsyncadd [#allocation3], 4294967264 }
 0x1fe   :  { %748 = vsyncpa [#allocation3], 1 }

</bundles_post_ra>
